<compile_context>
chip_gen: v6e
topology: v6e:2x2x1
jax: 0.10.0
libtpu: 0.0.40
codegen_flags: <defaults>
</compile_context>

<pallas_src>
import functools
import math

import jax
import jax.numpy as jnp
from jax.experimental import pallas as pl
from jax.experimental.pallas import tpu as pltpu

# ----- small config consistent with the Mistral module structure -----
BATCH = 2
SEQ = 8
HIDDEN = 32
INTERMEDIATE = 64
NUM_HEADS = 4
NUM_KV_HEADS = 2
HEAD_DIM = HIDDEN // NUM_HEADS
NUM_LAYERS = 2
VOCAB = 64
RMS_EPS = 1e-6
ROPE_THETA = 10000.0
PAD_TOKEN_ID = 0

BS = BATCH * SEQ                     # batch folded into sublanes
QW = NUM_HEADS * HEAD_DIM            # 32 fused-Q lanes
KW = NUM_KV_HEADS * HEAD_DIM         # 16 fused-K (and V) lanes
QKW = QW + KW                        # 48 roped lanes
VEND = QKW + KW                      # 64 = end of V in the fused projection
IN_LANES = 128                       # padded fused input-projection width
OUT_LANES = 128                      # padded logits width (lane-dense store)


# ---------------- fused whole-forward Pallas kernel ----------------

def _forward_kernel(x_ref, bias_ref, rope_ref, lnw_ref, w_in_ref, w_od_ref,
                    lmh_ref, out_ref, *, eps, scale, num_layers, num_heads,
                    num_kv_heads, head_dim, hidden, intermediate):
    h = x_ref[...]                       # (BS, H) f32 residual stream
    bias = bias_ref[...]                 # (BS, BS) f32 block-diag causal mask
    cos = rope_ref[0]                    # (BS, QKW)
    sin = rope_ref[1]                    # (BS, QKW)
    lnw = lnw_ref[...]                   # (2*L+1, H) f32 RMSNorm weights

    def rmsnorm(x, w):                   # statistics stay in f32
        var = jnp.mean(x * x, axis=-1, keepdims=True)
        return x * jax.lax.rsqrt(var + eps) * w

    def bdot(a, b):                      # bf16 MXU matmul, f32 accumulation
        return jnp.dot(a.astype(jnp.bfloat16), b.astype(jnp.bfloat16),
                       preferred_element_type=jnp.float32)

    q_w = num_heads * head_dim
    k_w = num_kv_heads * head_dim
    qk_w = q_w + k_w
    v_end = qk_w + k_w
    n_rep = num_heads // num_kv_heads

    for li in range(num_layers):         # unrolled: weights are VMEM-resident
        w_in = w_in_ref[li]              # (2H, 128) bf16: [qkv|rot(qk)|pad ; gate|up]
        w_od = w_od_ref[li]              # (H+I, H) bf16: [o-proj ; down-proj]

        # ---------------- self-attention block ----------------
        hn = rmsnorm(h, lnw[2 * li:2 * li + 1])
        proj = bdot(hn, w_in[:hidden])                               # (BS, 128)
        # RoPE: rotation was folded into the weights (Wqk @ R), so here it is
        # just elementwise: roped = qk * cos + (x @ Wqk @ R) * sin.
        qk = proj[:, :qk_w] * cos + proj[:, v_end:v_end + qk_w] * sin
        v = proj[:, qk_w:v_end]                                       # (BS, KW)

        outs = []
        for hd in range(num_heads):      # scores/softmax on slices of fused q/k/v
            qh = qk[:, hd * head_dim:(hd + 1) * head_dim]             # (BS, D)
            kv = hd // n_rep                                          # GQA share
            kh = qk[:, q_w + kv * head_dim:q_w + (kv + 1) * head_dim]
            vh = v[:, kv * head_dim:(kv + 1) * head_dim]
            s = jax.lax.dot_general(
                qh.astype(jnp.bfloat16), kh.astype(jnp.bfloat16),
                dimension_numbers=(((1,), (1,)), ((), ())),
                preferred_element_type=jnp.float32) * scale
            s = s + bias                                              # f32 mask add
            m = jnp.max(s, axis=-1, keepdims=True)
            p = jnp.exp(s - m)
            denom = jnp.sum(p, axis=-1, keepdims=True)
            outs.append(bdot(p, vh) / denom)                          # (BS, D)
        attn = jnp.concatenate(outs, axis=-1)                         # (BS, QW)
        h = h + bdot(attn, w_od[:hidden])                             # o-proj + residual

        # ---------------- mlp block ----------------
        hn2 = rmsnorm(h, lnw[2 * li + 1:2 * li + 2])
        gu = bdot(hn2, w_in[hidden:])                                 # (BS, 2I) lane-dense
        g = gu[:, :intermediate]
        u = gu[:, intermediate:]
        h = h + bdot(g * jax.nn.sigmoid(g) * u, w_od[hidden:])        # down + residual

    # final RMSNorm + lm_head projection; output is 128-lane (unmasked store)
    hf = rmsnorm(h, lnw[2 * num_layers:2 * num_layers + 1])
    out_ref[...] = bdot(hf, lmh_ref[...])                             # (BS, 128)


# ---------------- params, packing, forward ----------------

def rope_cos_sin(seq_len, dim, theta):
    inv_freq = 1.0 / (theta ** (jnp.arange(0, dim, 2, dtype=jnp.float32) / dim))
    pos = jnp.arange(seq_len, dtype=jnp.float32)
    freqs = pos[:, None] * inv_freq[None, :]
    emb = jnp.concatenate([freqs, freqs], axis=-1)
    return jnp.cos(emb), jnp.sin(emb)


def rotate_half_matrix(dim):
    # (x @ R) == rotate_half(x) == concat([-x[:, d/2:], x[:, :d/2]], -1)
    half = dim // 2
    idx = jnp.arange(half)
    r = jnp.zeros((dim, dim), jnp.float32)
    r = r.at[idx + half, idx].set(-1.0)
    r = r.at[idx, idx + half].set(1.0)
    return r


def init_params(key):
    keys = jax.random.split(key, 2 + NUM_LAYERS)
    embed = jax.random.normal(keys[0], (VOCAB, HIDDEN), jnp.float32)
    embed = embed.at[PAD_TOKEN_ID].set(0.0)          # nn.Embedding padding_idx row
    lm_head = (jax.random.uniform(keys[1], (HIDDEN, VOCAB), jnp.float32,
                                  minval=-1.0, maxval=1.0) / math.sqrt(HIDDEN))
    scale = 0.02
    wq, wk, wv, wo, wg, wu, wd = [], [], [], [], [], [], []
    for li in range(NUM_LAYERS):
        lk = jax.random.split(keys[2 + li], 7)
        wq.append(scale * jax.random.normal(lk[0], (NUM_HEADS, HIDDEN, HEAD_DIM), jnp.float32))
        wk.append(scale * jax.random.normal(lk[1], (NUM_KV_HEADS, HIDDEN, HEAD_DIM), jnp.float32))
        wv.append(scale * jax.random.normal(lk[2], (NUM_KV_HEADS, HIDDEN, HEAD_DIM), jnp.float32))
        wo.append(scale * jax.random.normal(lk[3], (NUM_HEADS, HEAD_DIM, HIDDEN), jnp.float32))
        wg.append(scale * jax.random.normal(lk[4], (HIDDEN, INTERMEDIATE), jnp.float32))
        wu.append(scale * jax.random.normal(lk[5], (HIDDEN, INTERMEDIATE), jnp.float32))
        wd.append(scale * jax.random.normal(lk[6], (INTERMEDIATE, HIDDEN), jnp.float32))
    return dict(
        embed=embed, lm_head=lm_head,
        ln1=jnp.ones((NUM_LAYERS, HIDDEN), jnp.float32),
        ln2=jnp.ones((NUM_LAYERS, HIDDEN), jnp.float32),
        norm=jnp.ones((HIDDEN,), jnp.float32),
        wq=jnp.stack(wq), wk=jnp.stack(wk), wv=jnp.stack(wv), wo=jnp.stack(wo),
        wg=jnp.stack(wg), wu=jnp.stack(wu), wd=jnp.stack(wd),
    )


def pack_params(params):
    """Fuse / pack / pre-cast weights for the single-shot kernel (runs once)."""
    # block-diagonal rotate_half over the fused [4 Q heads | 2 KV heads] layout
    r_qk = jnp.kron(jnp.eye(NUM_HEADS + NUM_KV_HEADS, dtype=jnp.float32),
                    rotate_half_matrix(HEAD_DIM))                       # (QKW, QKW)
    w_in_layers, w_od_layers = [], []
    for li in range(NUM_LAYERS):
        wq = params["wq"][li].transpose(1, 0, 2).reshape(HIDDEN, QW)    # head-major lanes
        wk = params["wk"][li].transpose(1, 0, 2).reshape(HIDDEN, KW)
        wv = params["wv"][li].transpose(1, 0, 2).reshape(HIDDEN, KW)
        wqkv = jnp.concatenate([wq, wk, wv], axis=1)                    # (H, VEND)
        wqk_rot = wqkv[:, :QKW] @ r_qk                                  # fold RoPE rotation
        w_attn = jnp.concatenate(
            [wqkv, wqk_rot,
             jnp.zeros((HIDDEN, IN_LANES - VEND - QKW), jnp.float32)], axis=1)  # (H, 128)
        wgu = jnp.concatenate([params["wg"][li], params["wu"][li]], axis=1)     # (H, 128)
        w_in_layers.append(jnp.concatenate([w_attn, wgu], axis=0))      # (2H, 128)
        wo = params["wo"][li].reshape(QW, HIDDEN)                        # (QW, H)
        w_od_layers.append(jnp.concatenate([wo, params["wd"][li]], axis=0))     # (QW+I, H)

    lnw = jnp.concatenate([
        jnp.stack([params["ln1"], params["ln2"]], axis=1).reshape(2 * NUM_LAYERS, HIDDEN),
        params["norm"][None, :]], axis=0)                               # (2L+1, H)

    lmh = jnp.zeros((HIDDEN, OUT_LANES), jnp.float32)
    lmh = lmh.at[:, :VOCAB].set(params["lm_head"])                      # lane-dense pad

    return dict(
        embed=params["embed"],
        lnw=lnw,
        w_in=jnp.stack(w_in_layers).astype(jnp.bfloat16),               # (L, 2H, 128)
        w_od=jnp.stack(w_od_layers).astype(jnp.bfloat16),               # (L, H+I, H)
        lm_head=lmh.astype(jnp.bfloat16),                               # (H, 128)
    )


@jax.jit
def mistral_forward(packed, input_ids):
    batch, seq = input_ids.shape
    # TODO(synk): embedding row-gather stays in XLA; a Pallas DMA-gather kernel
    # is not worthwhile at this scale.
    x = packed["embed"][input_ids].astype(jnp.float32).reshape(batch * seq, HIDDEN)

    # Block-diagonal causal bias over the batch-folded row axis (no cross-batch leak).
    rows = jnp.arange(batch * seq, dtype=jnp.int32)
    b_idx, p_idx = rows // seq, rows % seq
    allowed = (b_idx[:, None] == b_idx[None, :]) & (p_idx[None, :] <= p_idx[:, None])
    bias = jnp.where(allowed, 0.0, -1e30).astype(jnp.float32)

    # RoPE tables tiled to the batch-folded, head-fused [Q|K] lane layout.
    cos, sin = rope_cos_sin(seq, HEAD_DIM, ROPE_THETA)                  # (S, D)
    cos_qk = jnp.concatenate([jnp.tile(cos, (batch, NUM_HEADS)),
                              jnp.tile(cos, (batch, NUM_KV_HEADS))], axis=1)
    sin_qk = jnp.concatenate([jnp.tile(sin, (batch, NUM_HEADS)),
                              jnp.tile(sin, (batch, NUM_KV_HEADS))], axis=1)
    rope_tab = jnp.stack([cos_qk, sin_qk])                              # (2, B*S, QKW)

    kernel = functools.partial(
        _forward_kernel, eps=RMS_EPS, scale=1.0 / math.sqrt(HEAD_DIM),
        num_layers=NUM_LAYERS, num_heads=NUM_HEADS, num_kv_heads=NUM_KV_HEADS,
        head_dim=HEAD_DIM, hidden=HIDDEN, intermediate=INTERMEDIATE)

    c2 = lambda i: (0, 0)
    c3 = lambda i: (0, 0, 0)

    logits_pad = pl.pallas_call(
        kernel,
        out_shape=jax.ShapeDtypeStruct((batch * seq, OUT_LANES), jnp.float32),
        grid=(1,),
        in_specs=[
            pl.BlockSpec((batch * seq, HIDDEN), c2),                   # embedded tokens
            pl.BlockSpec((batch * seq, batch * seq), c2),              # block-diag causal bias
            pl.BlockSpec((2, batch * seq, QKW), c3),                   # rope cos/sin
            pl.BlockSpec((2 * NUM_LAYERS + 1, HIDDEN), c2),            # all RMSNorm weights
            pl.BlockSpec((NUM_LAYERS, 2 * HIDDEN, IN_LANES), c3),      # qkv+rot | gate-up
            pl.BlockSpec((NUM_LAYERS, QW + INTERMEDIATE, HIDDEN), c3), # o-proj | down-proj
            pl.BlockSpec((HIDDEN, OUT_LANES), c2),                     # padded lm_head
        ],
        out_specs=pl.BlockSpec((batch * seq, OUT_LANES), c2),
        compiler_params=pltpu.CompilerParams(
            dimension_semantics=("arbitrary",)),
    )(x, bias, rope_tab, packed["lnw"], packed["w_in"], packed["w_od"],
      packed["lm_head"])

    return logits_pad[:, :VOCAB].reshape(batch, seq, VOCAB)


if __name__ == "__main__":
    key = jax.random.PRNGKey(0)
    pkey, ikey = jax.random.split(key)
    params = init_params(pkey)
    packed = pack_params(params)
    input_ids = jax.random.randint(ikey, (BATCH, SEQ), 0, VOCAB, dtype=jnp.int32)

    logits = mistral_forward(packed, input_ids)
    jax.block_until_ready(logits)
    assert logits.shape == (BATCH, SEQ, VOCAB)
    assert bool(jnp.all(jnp.isfinite(logits)))
    print("KERNEL_OK")
</pallas_src>

<mosaic_0001>
module attributes {stable_mosaic.version = 11 : i64} {
  func.func @_forward_kernel(%arg0: i32, %arg1: memref<16x32xf32, #tpu.memory_space<vmem>>, %arg2: memref<16x16xf32, #tpu.memory_space<vmem>>, %arg3: memref<2x16x48xf32, #tpu.memory_space<vmem>>, %arg4: memref<5x32xf32, #tpu.memory_space<vmem>>, %arg5: memref<2x64x128xbf16, #tpu.memory_space<vmem>>, %arg6: memref<2x96x32xbf16, #tpu.memory_space<vmem>>, %arg7: memref<32x128xbf16, #tpu.memory_space<vmem>>, %arg8: memref<16x128xf32, #tpu.memory_space<vmem>>) attributes {dimension_semantics = [#tpu.dimension_semantics<arbitrary>], iteration_bounds = array<i64: 1>, scalar_prefetch = 0 : i64, scratch_operands = 0 : i64, tpu.core_type = #tpu.core_type<tc>, window_params = [{pipeline_mode = #tpu.pipeline_mode<synchronous>, transform_indices = @transform_0, window_bounds = array<i64: 16, 32>}, {pipeline_mode = #tpu.pipeline_mode<synchronous>, transform_indices = @transform_1, window_bounds = array<i64: 16, 16>}, {pipeline_mode = #tpu.pipeline_mode<synchronous>, transform_indices = @transform_2, window_bounds = array<i64: 2, 16, 48>}, {pipeline_mode = #tpu.pipeline_mode<synchronous>, transform_indices = @transform_3, window_bounds = array<i64: 5, 32>}, {pipeline_mode = #tpu.pipeline_mode<synchronous>, transform_indices = @transform_4, window_bounds = array<i64: 2, 64, 128>}, {pipeline_mode = #tpu.pipeline_mode<synchronous>, transform_indices = @transform_5, window_bounds = array<i64: 2, 96, 32>}, {pipeline_mode = #tpu.pipeline_mode<synchronous>, transform_indices = @transform_6, window_bounds = array<i64: 32, 128>}, {pipeline_mode = #tpu.pipeline_mode<synchronous>, transform_indices = @transform_7, window_bounds = array<i64: 16, 128>}]} {
    %c0 = arith.constant 0 : index
    %c0_0 = arith.constant 0 : index
    %0 = vector.load %arg1[%c0, %c0_0] : memref<16x32xf32, #tpu.memory_space<vmem>>, vector<16x32xf32>
    %c0_1 = arith.constant 0 : index
    %c0_2 = arith.constant 0 : index
    %1 = vector.load %arg2[%c0_1, %c0_2] : memref<16x16xf32, #tpu.memory_space<vmem>>, vector<16x16xf32>
    %c0_3 = arith.constant 0 : index
    %c0_4 = arith.constant 0 : index
    %c0_5 = arith.constant 0 : index
    %2 = vector.load %arg3[%c0_3, %c0_4, %c0_5] : memref<2x16x48xf32, #tpu.memory_space<vmem>>, vector<1x16x48xf32>
    %3 = vector.shape_cast %2 : vector<1x16x48xf32> to vector<16x48xf32>
    %c1 = arith.constant 1 : index
    %c0_6 = arith.constant 0 : index
    %c0_7 = arith.constant 0 : index
    %4 = vector.load %arg3[%c1, %c0_6, %c0_7] : memref<2x16x48xf32, #tpu.memory_space<vmem>>, vector<1x16x48xf32>
    %5 = vector.shape_cast %4 : vector<1x16x48xf32> to vector<16x48xf32>
    %c0_8 = arith.constant 0 : index
    %c0_9 = arith.constant 0 : index
    %6 = vector.load %arg4[%c0_8, %c0_9] : memref<5x32xf32, #tpu.memory_space<vmem>>, vector<5x32xf32>
    %c0_10 = arith.constant 0 : index
    %c0_11 = arith.constant 0 : index
    %c0_12 = arith.constant 0 : index
    %7 = vector.load %arg5[%c0_10, %c0_11, %c0_12] : memref<2x64x128xbf16, #tpu.memory_space<vmem>>, vector<1x64x128xbf16>
    %8 = vector.shape_cast %7 : vector<1x64x128xbf16> to vector<64x128xbf16>
    %c0_13 = arith.constant 0 : index
    %c0_14 = arith.constant 0 : index
    %c0_15 = arith.constant 0 : index
    %9 = vector.load %arg6[%c0_13, %c0_14, %c0_15] : memref<2x96x32xbf16, #tpu.memory_space<vmem>>, vector<1x96x32xbf16>
    %10 = vector.shape_cast %9 : vector<1x96x32xbf16> to vector<96x32xbf16>
    %11 = vector.extract_strided_slice %6 {offsets = [0, 0], sizes = [1, 32], strides = [1, 1]} : vector<5x32xf32> to vector<1x32xf32>
    %12 = arith.mulf %0, %0 : vector<16x32xf32>
    %cst = arith.constant dense<0.000000e+00> : vector<16xf32>
    %13 = vector.multi_reduction <add>, %12, %cst [1] : vector<16x32xf32> to vector<16xf32>
    %14 = vector.shape_cast %13 : vector<16xf32> to vector<16x1xf32>
    %cst_16 = arith.constant 3.200000e+01 : f32
    %15 = vector.broadcast %cst_16 : f32 to vector<16x1xf32>
    %16 = arith.divf %14, %15 : vector<16x1xf32>
    %cst_17 = arith.constant 9.99999997E-7 : f32
    %17 = vector.broadcast %cst_17 : f32 to vector<16x1xf32>
    %18 = arith.addf %16, %17 : vector<16x1xf32>
    %19 = math.rsqrt %18 : vector<16x1xf32>
    %20 = vector.broadcast %19 : vector<16x1xf32> to vector<16x32xf32>
    %21 = arith.mulf %0, %20 : vector<16x32xf32>
    %22 = vector.broadcast %11 : vector<1x32xf32> to vector<16x32xf32>
    %23 = arith.mulf %21, %22 : vector<16x32xf32>
    %24 = vector.extract_strided_slice %8 {offsets = [0, 0], sizes = [32, 128], strides = [1, 1]} : vector<64x128xbf16> to vector<32x128xbf16>
    %25 = arith.truncf %23 : vector<16x32xf32> to vector<16x32xbf16>
    %cst_18 = arith.constant dense<0.000000e+00> : vector<16x128xf32>
    %26 = tpu.matmul %25, %24, %cst_18 {dimension_numbers = #tpu.dot_dimension_numbers<[1], [0], [0], [1], [0, 0, 1, 1], [], []>} : vector<16x32xbf16>, vector<32x128xbf16>, vector<16x128xf32> -> vector<16x128xf32>
    %27 = vector.extract_strided_slice %26 {offsets = [0, 0], sizes = [16, 48], strides = [1, 1]} : vector<16x128xf32> to vector<16x48xf32>
    %28 = arith.mulf %27, %3 : vector<16x48xf32>
    %29 = vector.extract_strided_slice %26 {offsets = [0, 64], sizes = [16, 48], strides = [1, 1]} : vector<16x128xf32> to vector<16x48xf32>
    %30 = arith.mulf %29, %5 : vector<16x48xf32>
    %31 = arith.addf %28, %30 : vector<16x48xf32>
    %32 = vector.extract_strided_slice %26 {offsets = [0, 48], sizes = [16, 16], strides = [1, 1]} : vector<16x128xf32> to vector<16x16xf32>
    %33 = vector.extract_strided_slice %31 {offsets = [0, 0], sizes = [16, 8], strides = [1, 1]} : vector<16x48xf32> to vector<16x8xf32>
    %34 = vector.extract_strided_slice %31 {offsets = [0, 32], sizes = [16, 8], strides = [1, 1]} : vector<16x48xf32> to vector<16x8xf32>
    %35 = vector.extract_strided_slice %32 {offsets = [0, 0], sizes = [16, 8], strides = [1, 1]} : vector<16x16xf32> to vector<16x8xf32>
    %36 = arith.truncf %33 : vector<16x8xf32> to vector<16x8xbf16>
    %37 = arith.truncf %34 : vector<16x8xf32> to vector<16x8xbf16>
    %cst_19 = arith.constant dense<0.000000e+00> : vector<16x16xf32>
    %38 = tpu.matmul %36, %37, %cst_19 {dimension_numbers = #tpu.dot_dimension_numbers<[1], [1], [0], [0], [0, 0, 1, 0], [], []>} : vector<16x8xbf16>, vector<16x8xbf16>, vector<16x16xf32> -> vector<16x16xf32>
    %cst_20 = arith.constant 0.353553385 : f32
    %39 = vector.broadcast %cst_20 : f32 to vector<16x16xf32>
    %40 = arith.mulf %38, %39 : vector<16x16xf32>
    %41 = arith.addf %40, %1 : vector<16x16xf32>
    %cst_21 = arith.constant dense<0xFF800000> : vector<16xf32>
    %42 = vector.multi_reduction <maximumf>, %41, %cst_21 [1] : vector<16x16xf32> to vector<16xf32>
    %43 = vector.shape_cast %42 : vector<16xf32> to vector<16x1xf32>
    %44 = vector.broadcast %43 : vector<16x1xf32> to vector<16x16xf32>
    %45 = arith.subf %41, %44 : vector<16x16xf32>
    %46 = math.exp %45 : vector<16x16xf32>
    %cst_22 = arith.constant dense<0.000000e+00> : vector<16xf32>
    %47 = vector.multi_reduction <add>, %46, %cst_22 [1] : vector<16x16xf32> to vector<16xf32>
    %48 = vector.shape_cast %47 : vector<16xf32> to vector<16x1xf32>
    %49 = arith.truncf %46 : vector<16x16xf32> to vector<16x16xbf16>
    %50 = arith.truncf %35 : vector<16x8xf32> to vector<16x8xbf16>
    %cst_23 = arith.constant dense<0.000000e+00> : vector<16x8xf32>
    %51 = tpu.matmul %49, %50, %cst_23 {dimension_numbers = #tpu.dot_dimension_numbers<[1], [0], [0], [1], [0, 0, 1, 1], [], []>} : vector<16x16xbf16>, vector<16x8xbf16>, vector<16x8xf32> -> vector<16x8xf32>
    %52 = vector.broadcast %48 : vector<16x1xf32> to vector<16x8xf32>
    %53 = arith.divf %51, %52 : vector<16x8xf32>
    %54 = vector.extract_strided_slice %31 {offsets = [0, 8], sizes = [16, 8], strides = [1, 1]} : vector<16x48xf32> to vector<16x8xf32>
    %55 = vector.extract_strided_slice %31 {offsets = [0, 32], sizes = [16, 8], strides = [1, 1]} : vector<16x48xf32> to vector<16x8xf32>
    %56 = vector.extract_strided_slice %32 {offsets = [0, 0], sizes = [16, 8], strides = [1, 1]} : vector<16x16xf32> to vector<16x8xf32>
    %57 = arith.truncf %54 : vector<16x8xf32> to vector<16x8xbf16>
    %58 = arith.truncf %55 : vector<16x8xf32> to vector<16x8xbf16>
    %cst_24 = arith.constant dense<0.000000e+00> : vector<16x16xf32>
    %59 = tpu.matmul %57, %58, %cst_24 {dimension_numbers = #tpu.dot_dimension_numbers<[1], [1], [0], [0], [0, 0, 1, 0], [], []>} : vector<16x8xbf16>, vector<16x8xbf16>, vector<16x16xf32> -> vector<16x16xf32>
    %cst_25 = arith.constant 0.353553385 : f32
    %60 = vector.broadcast %cst_25 : f32 to vector<16x16xf32>
    %61 = arith.mulf %59, %60 : vector<16x16xf32>
    %62 = arith.addf %61, %1 : vector<16x16xf32>
    %cst_26 = arith.constant dense<0xFF800000> : vector<16xf32>
    %63 = vector.multi_reduction <maximumf>, %62, %cst_26 [1] : vector<16x16xf32> to vector<16xf32>
    %64 = vector.shape_cast %63 : vector<16xf32> to vector<16x1xf32>
    %65 = vector.broadcast %64 : vector<16x1xf32> to vector<16x16xf32>
    %66 = arith.subf %62, %65 : vector<16x16xf32>
    %67 = math.exp %66 : vector<16x16xf32>
    %cst_27 = arith.constant dense<0.000000e+00> : vector<16xf32>
    %68 = vector.multi_reduction <add>, %67, %cst_27 [1] : vector<16x16xf32> to vector<16xf32>
    %69 = vector.shape_cast %68 : vector<16xf32> to vector<16x1xf32>
    %70 = arith.truncf %67 : vector<16x16xf32> to vector<16x16xbf16>
    %71 = arith.truncf %56 : vector<16x8xf32> to vector<16x8xbf16>
    %cst_28 = arith.constant dense<0.000000e+00> : vector<16x8xf32>
    %72 = tpu.matmul %70, %71, %cst_28 {dimension_numbers = #tpu.dot_dimension_numbers<[1], [0], [0], [1], [0, 0, 1, 1], [], []>} : vector<16x16xbf16>, vector<16x8xbf16>, vector<16x8xf32> -> vector<16x8xf32>
    %73 = vector.broadcast %69 : vector<16x1xf32> to vector<16x8xf32>
    %74 = arith.divf %72, %73 : vector<16x8xf32>
    %75 = vector.extract_strided_slice %31 {offsets = [0, 16], sizes = [16, 8], strides = [1, 1]} : vector<16x48xf32> to vector<16x8xf32>
    %76 = vector.extract_strided_slice %31 {offsets = [0, 40], sizes = [16, 8], strides = [1, 1]} : vector<16x48xf32> to vector<16x8xf32>
    %77 = vector.extract_strided_slice %32 {offsets = [0, 8], sizes = [16, 8], strides = [1, 1]} : vector<16x16xf32> to vector<16x8xf32>
    %78 = arith.truncf %75 : vector<16x8xf32> to vector<16x8xbf16>
    %79 = arith.truncf %76 : vector<16x8xf32> to vector<16x8xbf16>
    %cst_29 = arith.constant dense<0.000000e+00> : vector<16x16xf32>
    %80 = tpu.matmul %78, %79, %cst_29 {dimension_numbers = #tpu.dot_dimension_numbers<[1], [1], [0], [0], [0, 0, 1, 0], [], []>} : vector<16x8xbf16>, vector<16x8xbf16>, vector<16x16xf32> -> vector<16x16xf32>
    %cst_30 = arith.constant 0.353553385 : f32
    %81 = vector.broadcast %cst_30 : f32 to vector<16x16xf32>
    %82 = arith.mulf %80, %81 : vector<16x16xf32>
    %83 = arith.addf %82, %1 : vector<16x16xf32>
    %cst_31 = arith.constant dense<0xFF800000> : vector<16xf32>
    %84 = vector.multi_reduction <maximumf>, %83, %cst_31 [1] : vector<16x16xf32> to vector<16xf32>
    %85 = vector.shape_cast %84 : vector<16xf32> to vector<16x1xf32>
    %86 = vector.broadcast %85 : vector<16x1xf32> to vector<16x16xf32>
    %87 = arith.subf %83, %86 : vector<16x16xf32>
    %88 = math.exp %87 : vector<16x16xf32>
    %cst_32 = arith.constant dense<0.000000e+00> : vector<16xf32>
    %89 = vector.multi_reduction <add>, %88, %cst_32 [1] : vector<16x16xf32> to vector<16xf32>
    %90 = vector.shape_cast %89 : vector<16xf32> to vector<16x1xf32>
    %91 = arith.truncf %88 : vector<16x16xf32> to vector<16x16xbf16>
    %92 = arith.truncf %77 : vector<16x8xf32> to vector<16x8xbf16>
    %cst_33 = arith.constant dense<0.000000e+00> : vector<16x8xf32>
    %93 = tpu.matmul %91, %92, %cst_33 {dimension_numbers = #tpu.dot_dimension_numbers<[1], [0], [0], [1], [0, 0, 1, 1], [], []>} : vector<16x16xbf16>, vector<16x8xbf16>, vector<16x8xf32> -> vector<16x8xf32>
    %94 = vector.broadcast %90 : vector<16x1xf32> to vector<16x8xf32>
    %95 = arith.divf %93, %94 : vector<16x8xf32>
    %96 = vector.extract_strided_slice %31 {offsets = [0, 24], sizes = [16, 8], strides = [1, 1]} : vector<16x48xf32> to vector<16x8xf32>
    %97 = vector.extract_strided_slice %31 {offsets = [0, 40], sizes = [16, 8], strides = [1, 1]} : vector<16x48xf32> to vector<16x8xf32>
    %98 = vector.extract_strided_slice %32 {offsets = [0, 8], sizes = [16, 8], strides = [1, 1]} : vector<16x16xf32> to vector<16x8xf32>
    %99 = arith.truncf %96 : vector<16x8xf32> to vector<16x8xbf16>
    %100 = arith.truncf %97 : vector<16x8xf32> to vector<16x8xbf16>
    %cst_34 = arith.constant dense<0.000000e+00> : vector<16x16xf32>
    %101 = tpu.matmul %99, %100, %cst_34 {dimension_numbers = #tpu.dot_dimension_numbers<[1], [1], [0], [0], [0, 0, 1, 0], [], []>} : vector<16x8xbf16>, vector<16x8xbf16>, vector<16x16xf32> -> vector<16x16xf32>
    %cst_35 = arith.constant 0.353553385 : f32
    %102 = vector.broadcast %cst_35 : f32 to vector<16x16xf32>
    %103 = arith.mulf %101, %102 : vector<16x16xf32>
    %104 = arith.addf %103, %1 : vector<16x16xf32>
    %cst_36 = arith.constant dense<0xFF800000> : vector<16xf32>
    %105 = vector.multi_reduction <maximumf>, %104, %cst_36 [1] : vector<16x16xf32> to vector<16xf32>
    %106 = vector.shape_cast %105 : vector<16xf32> to vector<16x1xf32>
    %107 = vector.broadcast %106 : vector<16x1xf32> to vector<16x16xf32>
    %108 = arith.subf %104, %107 : vector<16x16xf32>
    %109 = math.exp %108 : vector<16x16xf32>
    %cst_37 = arith.constant dense<0.000000e+00> : vector<16xf32>
    %110 = vector.multi_reduction <add>, %109, %cst_37 [1] : vector<16x16xf32> to vector<16xf32>
    %111 = vector.shape_cast %110 : vector<16xf32> to vector<16x1xf32>
    %112 = arith.truncf %109 : vector<16x16xf32> to vector<16x16xbf16>
    %113 = arith.truncf %98 : vector<16x8xf32> to vector<16x8xbf16>
    %cst_38 = arith.constant dense<0.000000e+00> : vector<16x8xf32>
    %114 = tpu.matmul %112, %113, %cst_38 {dimension_numbers = #tpu.dot_dimension_numbers<[1], [0], [0], [1], [0, 0, 1, 1], [], []>} : vector<16x16xbf16>, vector<16x8xbf16>, vector<16x8xf32> -> vector<16x8xf32>
    %115 = vector.broadcast %111 : vector<16x1xf32> to vector<16x8xf32>
    %116 = arith.divf %114, %115 : vector<16x8xf32>
    %117 = tpu.concatenate %53, %74, %95, %116 in 1 : vector<16x8xf32>, vector<16x8xf32>, vector<16x8xf32>, vector<16x8xf32> -> vector<16x32xf32>
    %118 = vector.extract_strided_slice %10 {offsets = [0, 0], sizes = [32, 32], strides = [1, 1]} : vector<96x32xbf16> to vector<32x32xbf16>
    %119 = arith.truncf %117 : vector<16x32xf32> to vector<16x32xbf16>
    %cst_39 = arith.constant dense<0.000000e+00> : vector<16x32xf32>
    %120 = tpu.matmul %119, %118, %cst_39 {dimension_numbers = #tpu.dot_dimension_numbers<[1], [0], [0], [1], [0, 0, 1, 1], [], []>} : vector<16x32xbf16>, vector<32x32xbf16>, vector<16x32xf32> -> vector<16x32xf32>
    %121 = arith.addf %0, %120 : vector<16x32xf32>
    %122 = vector.extract_strided_slice %6 {offsets = [1, 0], sizes = [1, 32], strides = [1, 1]} : vector<5x32xf32> to vector<1x32xf32>
    %123 = arith.mulf %121, %121 : vector<16x32xf32>
    %cst_40 = arith.constant dense<0.000000e+00> : vector<16xf32>
    %124 = vector.multi_reduction <add>, %123, %cst_40 [1] : vector<16x32xf32> to vector<16xf32>
    %125 = vector.shape_cast %124 : vector<16xf32> to vector<16x1xf32>
    %cst_41 = arith.constant 3.200000e+01 : f32
    %126 = vector.broadcast %cst_41 : f32 to vector<16x1xf32>
    %127 = arith.divf %125, %126 : vector<16x1xf32>
    %cst_42 = arith.constant 9.99999997E-7 : f32
    %128 = vector.broadcast %cst_42 : f32 to vector<16x1xf32>
    %129 = arith.addf %127, %128 : vector<16x1xf32>
    %130 = math.rsqrt %129 : vector<16x1xf32>
    %131 = vector.broadcast %130 : vector<16x1xf32> to vector<16x32xf32>
    %132 = arith.mulf %121, %131 : vector<16x32xf32>
    %133 = vector.broadcast %122 : vector<1x32xf32> to vector<16x32xf32>
    %134 = arith.mulf %132, %133 : vector<16x32xf32>
    %135 = vector.extract_strided_slice %8 {offsets = [32, 0], sizes = [32, 128], strides = [1, 1]} : vector<64x128xbf16> to vector<32x128xbf16>
    %136 = arith.truncf %134 : vector<16x32xf32> to vector<16x32xbf16>
    %cst_43 = arith.constant dense<0.000000e+00> : vector<16x128xf32>
    %137 = tpu.matmul %136, %135, %cst_43 {dimension_numbers = #tpu.dot_dimension_numbers<[1], [0], [0], [1], [0, 0, 1, 1], [], []>} : vector<16x32xbf16>, vector<32x128xbf16>, vector<16x128xf32> -> vector<16x128xf32>
    %138 = vector.extract_strided_slice %137 {offsets = [0, 0], sizes = [16, 64], strides = [1, 1]} : vector<16x128xf32> to vector<16x64xf32>
    %139 = vector.extract_strided_slice %137 {offsets = [0, 64], sizes = [16, 64], strides = [1, 1]} : vector<16x128xf32> to vector<16x64xf32>
    %140 = arith.negf %138 : vector<16x64xf32>
    %141 = math.exp %140 : vector<16x64xf32>
    %cst_44 = arith.constant 1.000000e+00 : f32
    %142 = vector.broadcast %cst_44 : f32 to vector<16x64xf32>
    %143 = arith.addf %142, %141 : vector<16x64xf32>
    %144 = arith.divf %142, %143 : vector<16x64xf32>
    %145 = arith.mulf %138, %144 : vector<16x64xf32>
    %146 = arith.mulf %145, %139 : vector<16x64xf32>
    %147 = vector.extract_strided_slice %10 {offsets = [32, 0], sizes = [64, 32], strides = [1, 1]} : vector<96x32xbf16> to vector<64x32xbf16>
    %148 = arith.truncf %146 : vector<16x64xf32> to vector<16x64xbf16>
    %cst_45 = arith.constant dense<0.000000e+00> : vector<16x32xf32>
    %149 = tpu.matmul %148, %147, %cst_45 {dimension_numbers = #tpu.dot_dimension_numbers<[1], [0], [0], [1], [0, 0, 1, 1], [], []>} : vector<16x64xbf16>, vector<64x32xbf16>, vector<16x32xf32> -> vector<16x32xf32>
    %150 = arith.addf %121, %149 : vector<16x32xf32>
    %c1_46 = arith.constant 1 : index
    %c0_47 = arith.constant 0 : index
    %c0_48 = arith.constant 0 : index
    %151 = vector.load %arg5[%c1_46, %c0_47, %c0_48] : memref<2x64x128xbf16, #tpu.memory_space<vmem>>, vector<1x64x128xbf16>
    %152 = vector.shape_cast %151 : vector<1x64x128xbf16> to vector<64x128xbf16>
    %c1_49 = arith.constant 1 : index
    %c0_50 = arith.constant 0 : index
    %c0_51 = arith.constant 0 : index
    %153 = vector.load %arg6[%c1_49, %c0_50, %c0_51] : memref<2x96x32xbf16, #tpu.memory_space<vmem>>, vector<1x96x32xbf16>
    %154 = vector.shape_cast %153 : vector<1x96x32xbf16> to vector<96x32xbf16>
    %155 = vector.extract_strided_slice %6 {offsets = [2, 0], sizes = [1, 32], strides = [1, 1]} : vector<5x32xf32> to vector<1x32xf32>
    %156 = arith.mulf %150, %150 : vector<16x32xf32>
    %cst_52 = arith.constant dense<0.000000e+00> : vector<16xf32>
    %157 = vector.multi_reduction <add>, %156, %cst_52 [1] : vector<16x32xf32> to vector<16xf32>
    %158 = vector.shape_cast %157 : vector<16xf32> to vector<16x1xf32>
    %cst_53 = arith.constant 3.200000e+01 : f32
    %159 = vector.broadcast %cst_53 : f32 to vector<16x1xf32>
    %160 = arith.divf %158, %159 : vector<16x1xf32>
    %cst_54 = arith.constant 9.99999997E-7 : f32
    %161 = vector.broadcast %cst_54 : f32 to vector<16x1xf32>
    %162 = arith.addf %160, %161 : vector<16x1xf32>
    %163 = math.rsqrt %162 : vector<16x1xf32>
    %164 = vector.broadcast %163 : vector<16x1xf32> to vector<16x32xf32>
    %165 = arith.mulf %150, %164 : vector<16x32xf32>
    %166 = vector.broadcast %155 : vector<1x32xf32> to vector<16x32xf32>
    %167 = arith.mulf %165, %166 : vector<16x32xf32>
    %168 = vector.extract_strided_slice %152 {offsets = [0, 0], sizes = [32, 128], strides = [1, 1]} : vector<64x128xbf16> to vector<32x128xbf16>
    %169 = arith.truncf %167 : vector<16x32xf32> to vector<16x32xbf16>
    %cst_55 = arith.constant dense<0.000000e+00> : vector<16x128xf32>
    %170 = tpu.matmul %169, %168, %cst_55 {dimension_numbers = #tpu.dot_dimension_numbers<[1], [0], [0], [1], [0, 0, 1, 1], [], []>} : vector<16x32xbf16>, vector<32x128xbf16>, vector<16x128xf32> -> vector<16x128xf32>
    %171 = vector.extract_strided_slice %170 {offsets = [0, 0], sizes = [16, 48], strides = [1, 1]} : vector<16x128xf32> to vector<16x48xf32>
    %172 = arith.mulf %171, %3 : vector<16x48xf32>
    %173 = vector.extract_strided_slice %170 {offsets = [0, 64], sizes = [16, 48], strides = [1, 1]} : vector<16x128xf32> to vector<16x48xf32>
    %174 = arith.mulf %173, %5 : vector<16x48xf32>
    %175 = arith.addf %172, %174 : vector<16x48xf32>
    %176 = vector.extract_strided_slice %170 {offsets = [0, 48], sizes = [16, 16], strides = [1, 1]} : vector<16x128xf32> to vector<16x16xf32>
    %177 = vector.extract_strided_slice %175 {offsets = [0, 0], sizes = [16, 8], strides = [1, 1]} : vector<16x48xf32> to vector<16x8xf32>
    %178 = vector.extract_strided_slice %175 {offsets = [0, 32], sizes = [16, 8], strides = [1, 1]} : vector<16x48xf32> to vector<16x8xf32>
    %179 = vector.extract_strided_slice %176 {offsets = [0, 0], sizes = [16, 8], strides = [1, 1]} : vector<16x16xf32> to vector<16x8xf32>
    %180 = arith.truncf %177 : vector<16x8xf32> to vector<16x8xbf16>
    %181 = arith.truncf %178 : vector<16x8xf32> to vector<16x8xbf16>
    %cst_56 = arith.constant dense<0.000000e+00> : vector<16x16xf32>
    %182 = tpu.matmul %180, %181, %cst_56 {dimension_numbers = #tpu.dot_dimension_numbers<[1], [1], [0], [0], [0, 0, 1, 0], [], []>} : vector<16x8xbf16>, vector<16x8xbf16>, vector<16x16xf32> -> vector<16x16xf32>
    %cst_57 = arith.constant 0.353553385 : f32
    %183 = vector.broadcast %cst_57 : f32 to vector<16x16xf32>
    %184 = arith.mulf %182, %183 : vector<16x16xf32>
    %185 = arith.addf %184, %1 : vector<16x16xf32>
    %cst_58 = arith.constant dense<0xFF800000> : vector<16xf32>
    %186 = vector.multi_reduction <maximumf>, %185, %cst_58 [1] : vector<16x16xf32> to vector<16xf32>
    %187 = vector.shape_cast %186 : vector<16xf32> to vector<16x1xf32>
    %188 = vector.broadcast %187 : vector<16x1xf32> to vector<16x16xf32>
    %189 = arith.subf %185, %188 : vector<16x16xf32>
    %190 = math.exp %189 : vector<16x16xf32>
    %cst_59 = arith.constant dense<0.000000e+00> : vector<16xf32>
    %191 = vector.multi_reduction <add>, %190, %cst_59 [1] : vector<16x16xf32> to vector<16xf32>
    %192 = vector.shape_cast %191 : vector<16xf32> to vector<16x1xf32>
    %193 = arith.truncf %190 : vector<16x16xf32> to vector<16x16xbf16>
    %194 = arith.truncf %179 : vector<16x8xf32> to vector<16x8xbf16>
    %cst_60 = arith.constant dense<0.000000e+00> : vector<16x8xf32>
    %195 = tpu.matmul %193, %194, %cst_60 {dimension_numbers = #tpu.dot_dimension_numbers<[1], [0], [0], [1], [0, 0, 1, 1], [], []>} : vector<16x16xbf16>, vector<16x8xbf16>, vector<16x8xf32> -> vector<16x8xf32>
    %196 = vector.broadcast %192 : vector<16x1xf32> to vector<16x8xf32>
    %197 = arith.divf %195, %196 : vector<16x8xf32>
    %198 = vector.extract_strided_slice %175 {offsets = [0, 8], sizes = [16, 8], strides = [1, 1]} : vector<16x48xf32> to vector<16x8xf32>
    %199 = vector.extract_strided_slice %175 {offsets = [0, 32], sizes = [16, 8], strides = [1, 1]} : vector<16x48xf32> to vector<16x8xf32>
    %200 = vector.extract_strided_slice %176 {offsets = [0, 0], sizes = [16, 8], strides = [1, 1]} : vector<16x16xf32> to vector<16x8xf32>
    %201 = arith.truncf %198 : vector<16x8xf32> to vector<16x8xbf16>
    %202 = arith.truncf %199 : vector<16x8xf32> to vector<16x8xbf16>
    %cst_61 = arith.constant dense<0.000000e+00> : vector<16x16xf32>
    %203 = tpu.matmul %201, %202, %cst_61 {dimension_numbers = #tpu.dot_dimension_numbers<[1], [1], [0], [0], [0, 0, 1, 0], [], []>} : vector<16x8xbf16>, vector<16x8xbf16>, vector<16x16xf32> -> vector<16x16xf32>
    %cst_62 = arith.constant 0.353553385 : f32
    %204 = vector.broadcast %cst_62 : f32 to vector<16x16xf32>
    %205 = arith.mulf %203, %204 : vector<16x16xf32>
    %206 = arith.addf %205, %1 : vector<16x16xf32>
    %cst_63 = arith.constant dense<0xFF800000> : vector<16xf32>
    %207 = vector.multi_reduction <maximumf>, %206, %cst_63 [1] : vector<16x16xf32> to vector<16xf32>
    %208 = vector.shape_cast %207 : vector<16xf32> to vector<16x1xf32>
    %209 = vector.broadcast %208 : vector<16x1xf32> to vector<16x16xf32>
    %210 = arith.subf %206, %209 : vector<16x16xf32>
    %211 = math.exp %210 : vector<16x16xf32>
    %cst_64 = arith.constant dense<0.000000e+00> : vector<16xf32>
    %212 = vector.multi_reduction <add>, %211, %cst_64 [1] : vector<16x16xf32> to vector<16xf32>
    %213 = vector.shape_cast %212 : vector<16xf32> to vector<16x1xf32>
    %214 = arith.truncf %211 : vector<16x16xf32> to vector<16x16xbf16>
    %215 = arith.truncf %200 : vector<16x8xf32> to vector<16x8xbf16>
    %cst_65 = arith.constant dense<0.000000e+00> : vector<16x8xf32>
    %216 = tpu.matmul %214, %215, %cst_65 {dimension_numbers = #tpu.dot_dimension_numbers<[1], [0], [0], [1], [0, 0, 1, 1], [], []>} : vector<16x16xbf16>, vector<16x8xbf16>, vector<16x8xf32> -> vector<16x8xf32>
    %217 = vector.broadcast %213 : vector<16x1xf32> to vector<16x8xf32>
    %218 = arith.divf %216, %217 : vector<16x8xf32>
    %219 = vector.extract_strided_slice %175 {offsets = [0, 16], sizes = [16, 8], strides = [1, 1]} : vector<16x48xf32> to vector<16x8xf32>
    %220 = vector.extract_strided_slice %175 {offsets = [0, 40], sizes = [16, 8], strides = [1, 1]} : vector<16x48xf32> to vector<16x8xf32>
    %221 = vector.extract_strided_slice %176 {offsets = [0, 8], sizes = [16, 8], strides = [1, 1]} : vector<16x16xf32> to vector<16x8xf32>
    %222 = arith.truncf %219 : vector<16x8xf32> to vector<16x8xbf16>
    %223 = arith.truncf %220 : vector<16x8xf32> to vector<16x8xbf16>
    %cst_66 = arith.constant dense<0.000000e+00> : vector<16x16xf32>
    %224 = tpu.matmul %222, %223, %cst_66 {dimension_numbers = #tpu.dot_dimension_numbers<[1], [1], [0], [0], [0, 0, 1, 0], [], []>} : vector<16x8xbf16>, vector<16x8xbf16>, vector<16x16xf32> -> vector<16x16xf32>
    %cst_67 = arith.constant 0.353553385 : f32
    %225 = vector.broadcast %cst_67 : f32 to vector<16x16xf32>
    %226 = arith.mulf %224, %225 : vector<16x16xf32>
    %227 = arith.addf %226, %1 : vector<16x16xf32>
    %cst_68 = arith.constant dense<0xFF800000> : vector<16xf32>
    %228 = vector.multi_reduction <maximumf>, %227, %cst_68 [1] : vector<16x16xf32> to vector<16xf32>
    %229 = vector.shape_cast %228 : vector<16xf32> to vector<16x1xf32>
    %230 = vector.broadcast %229 : vector<16x1xf32> to vector<16x16xf32>
    %231 = arith.subf %227, %230 : vector<16x16xf32>
    %232 = math.exp %231 : vector<16x16xf32>
    %cst_69 = arith.constant dense<0.000000e+00> : vector<16xf32>
    %233 = vector.multi_reduction <add>, %232, %cst_69 [1] : vector<16x16xf32> to vector<16xf32>
    %234 = vector.shape_cast %233 : vector<16xf32> to vector<16x1xf32>
    %235 = arith.truncf %232 : vector<16x16xf32> to vector<16x16xbf16>
    %236 = arith.truncf %221 : vector<16x8xf32> to vector<16x8xbf16>
    %cst_70 = arith.constant dense<0.000000e+00> : vector<16x8xf32>
    %237 = tpu.matmul %235, %236, %cst_70 {dimension_numbers = #tpu.dot_dimension_numbers<[1], [0], [0], [1], [0, 0, 1, 1], [], []>} : vector<16x16xbf16>, vector<16x8xbf16>, vector<16x8xf32> -> vector<16x8xf32>
    %238 = vector.broadcast %234 : vector<16x1xf32> to vector<16x8xf32>
    %239 = arith.divf %237, %238 : vector<16x8xf32>
    %240 = vector.extract_strided_slice %175 {offsets = [0, 24], sizes = [16, 8], strides = [1, 1]} : vector<16x48xf32> to vector<16x8xf32>
    %241 = vector.extract_strided_slice %175 {offsets = [0, 40], sizes = [16, 8], strides = [1, 1]} : vector<16x48xf32> to vector<16x8xf32>
    %242 = vector.extract_strided_slice %176 {offsets = [0, 8], sizes = [16, 8], strides = [1, 1]} : vector<16x16xf32> to vector<16x8xf32>
    %243 = arith.truncf %240 : vector<16x8xf32> to vector<16x8xbf16>
    %244 = arith.truncf %241 : vector<16x8xf32> to vector<16x8xbf16>
    %cst_71 = arith.constant dense<0.000000e+00> : vector<16x16xf32>
    %245 = tpu.matmul %243, %244, %cst_71 {dimension_numbers = #tpu.dot_dimension_numbers<[1], [1], [0], [0], [0, 0, 1, 0], [], []>} : vector<16x8xbf16>, vector<16x8xbf16>, vector<16x16xf32> -> vector<16x16xf32>
    %cst_72 = arith.constant 0.353553385 : f32
    %246 = vector.broadcast %cst_72 : f32 to vector<16x16xf32>
    %247 = arith.mulf %245, %246 : vector<16x16xf32>
    %248 = arith.addf %247, %1 : vector<16x16xf32>
    %cst_73 = arith.constant dense<0xFF800000> : vector<16xf32>
    %249 = vector.multi_reduction <maximumf>, %248, %cst_73 [1] : vector<16x16xf32> to vector<16xf32>
    %250 = vector.shape_cast %249 : vector<16xf32> to vector<16x1xf32>
    %251 = vector.broadcast %250 : vector<16x1xf32> to vector<16x16xf32>
    %252 = arith.subf %248, %251 : vector<16x16xf32>
    %253 = math.exp %252 : vector<16x16xf32>
    %cst_74 = arith.constant dense<0.000000e+00> : vector<16xf32>
    %254 = vector.multi_reduction <add>, %253, %cst_74 [1] : vector<16x16xf32> to vector<16xf32>
    %255 = vector.shape_cast %254 : vector<16xf32> to vector<16x1xf32>
    %256 = arith.truncf %253 : vector<16x16xf32> to vector<16x16xbf16>
    %257 = arith.truncf %242 : vector<16x8xf32> to vector<16x8xbf16>
    %cst_75 = arith.constant dense<0.000000e+00> : vector<16x8xf32>
    %258 = tpu.matmul %256, %257, %cst_75 {dimension_numbers = #tpu.dot_dimension_numbers<[1], [0], [0], [1], [0, 0, 1, 1], [], []>} : vector<16x16xbf16>, vector<16x8xbf16>, vector<16x8xf32> -> vector<16x8xf32>
    %259 = vector.broadcast %255 : vector<16x1xf32> to vector<16x8xf32>
    %260 = arith.divf %258, %259 : vector<16x8xf32>
    %261 = tpu.concatenate %197, %218, %239, %260 in 1 : vector<16x8xf32>, vector<16x8xf32>, vector<16x8xf32>, vector<16x8xf32> -> vector<16x32xf32>
    %262 = vector.extract_strided_slice %154 {offsets = [0, 0], sizes = [32, 32], strides = [1, 1]} : vector<96x32xbf16> to vector<32x32xbf16>
    %263 = arith.truncf %261 : vector<16x32xf32> to vector<16x32xbf16>
    %cst_76 = arith.constant dense<0.000000e+00> : vector<16x32xf32>
    %264 = tpu.matmul %263, %262, %cst_76 {dimension_numbers = #tpu.dot_dimension_numbers<[1], [0], [0], [1], [0, 0, 1, 1], [], []>} : vector<16x32xbf16>, vector<32x32xbf16>, vector<16x32xf32> -> vector<16x32xf32>
    %265 = arith.addf %150, %264 : vector<16x32xf32>
    %266 = vector.extract_strided_slice %6 {offsets = [3, 0], sizes = [1, 32], strides = [1, 1]} : vector<5x32xf32> to vector<1x32xf32>
    %267 = arith.mulf %265, %265 : vector<16x32xf32>
    %cst_77 = arith.constant dense<0.000000e+00> : vector<16xf32>
    %268 = vector.multi_reduction <add>, %267, %cst_77 [1] : vector<16x32xf32> to vector<16xf32>
    %269 = vector.shape_cast %268 : vector<16xf32> to vector<16x1xf32>
    %cst_78 = arith.constant 3.200000e+01 : f32
    %270 = vector.broadcast %cst_78 : f32 to vector<16x1xf32>
    %271 = arith.divf %269, %270 : vector<16x1xf32>
    %cst_79 = arith.constant 9.99999997E-7 : f32
    %272 = vector.broadcast %cst_79 : f32 to vector<16x1xf32>
    %273 = arith.addf %271, %272 : vector<16x1xf32>
    %274 = math.rsqrt %273 : vector<16x1xf32>
    %275 = vector.broadcast %274 : vector<16x1xf32> to vector<16x32xf32>
    %276 = arith.mulf %265, %275 : vector<16x32xf32>
    %277 = vector.broadcast %266 : vector<1x32xf32> to vector<16x32xf32>
    %278 = arith.mulf %276, %277 : vector<16x32xf32>
    %279 = vector.extract_strided_slice %152 {offsets = [32, 0], sizes = [32, 128], strides = [1, 1]} : vector<64x128xbf16> to vector<32x128xbf16>
    %280 = arith.truncf %278 : vector<16x32xf32> to vector<16x32xbf16>
    %cst_80 = arith.constant dense<0.000000e+00> : vector<16x128xf32>
    %281 = tpu.matmul %280, %279, %cst_80 {dimension_numbers = #tpu.dot_dimension_numbers<[1], [0], [0], [1], [0, 0, 1, 1], [], []>} : vector<16x32xbf16>, vector<32x128xbf16>, vector<16x128xf32> -> vector<16x128xf32>
    %282 = vector.extract_strided_slice %281 {offsets = [0, 0], sizes = [16, 64], strides = [1, 1]} : vector<16x128xf32> to vector<16x64xf32>
    %283 = vector.extract_strided_slice %281 {offsets = [0, 64], sizes = [16, 64], strides = [1, 1]} : vector<16x128xf32> to vector<16x64xf32>
    %284 = arith.negf %282 : vector<16x64xf32>
    %285 = math.exp %284 : vector<16x64xf32>
    %cst_81 = arith.constant 1.000000e+00 : f32
    %286 = vector.broadcast %cst_81 : f32 to vector<16x64xf32>
    %287 = arith.addf %286, %285 : vector<16x64xf32>
    %288 = arith.divf %286, %287 : vector<16x64xf32>
    %289 = arith.mulf %282, %288 : vector<16x64xf32>
    %290 = arith.mulf %289, %283 : vector<16x64xf32>
    %291 = vector.extract_strided_slice %154 {offsets = [32, 0], sizes = [64, 32], strides = [1, 1]} : vector<96x32xbf16> to vector<64x32xbf16>
    %292 = arith.truncf %290 : vector<16x64xf32> to vector<16x64xbf16>
    %cst_82 = arith.constant dense<0.000000e+00> : vector<16x32xf32>
    %293 = tpu.matmul %292, %291, %cst_82 {dimension_numbers = #tpu.dot_dimension_numbers<[1], [0], [0], [1], [0, 0, 1, 1], [], []>} : vector<16x64xbf16>, vector<64x32xbf16>, vector<16x32xf32> -> vector<16x32xf32>
    %294 = arith.addf %265, %293 : vector<16x32xf32>
    %295 = vector.extract_strided_slice %6 {offsets = [4, 0], sizes = [1, 32], strides = [1, 1]} : vector<5x32xf32> to vector<1x32xf32>
    %296 = arith.mulf %294, %294 : vector<16x32xf32>
    %cst_83 = arith.constant dense<0.000000e+00> : vector<16xf32>
    %297 = vector.multi_reduction <add>, %296, %cst_83 [1] : vector<16x32xf32> to vector<16xf32>
    %298 = vector.shape_cast %297 : vector<16xf32> to vector<16x1xf32>
    %cst_84 = arith.constant 3.200000e+01 : f32
    %299 = vector.broadcast %cst_84 : f32 to vector<16x1xf32>
    %300 = arith.divf %298, %299 : vector<16x1xf32>
    %cst_85 = arith.constant 9.99999997E-7 : f32
    %301 = vector.broadcast %cst_85 : f32 to vector<16x1xf32>
    %302 = arith.addf %300, %301 : vector<16x1xf32>
    %303 = math.rsqrt %302 : vector<16x1xf32>
    %304 = vector.broadcast %303 : vector<16x1xf32> to vector<16x32xf32>
    %305 = arith.mulf %294, %304 : vector<16x32xf32>
    %306 = vector.broadcast %295 : vector<1x32xf32> to vector<16x32xf32>
    %307 = arith.mulf %305, %306 : vector<16x32xf32>
    %c0_86 = arith.constant 0 : index
    %c0_87 = arith.constant 0 : index
    %308 = vector.load %arg7[%c0_86, %c0_87] : memref<32x128xbf16, #tpu.memory_space<vmem>>, vector<32x128xbf16>
    %309 = arith.truncf %307 : vector<16x32xf32> to vector<16x32xbf16>
    %cst_88 = arith.constant dense<0.000000e+00> : vector<16x128xf32>
    %310 = tpu.matmul %309, %308, %cst_88 {dimension_numbers = #tpu.dot_dimension_numbers<[1], [0], [0], [1], [0, 0, 1, 1], [], []>} : vector<16x32xbf16>, vector<32x128xbf16>, vector<16x128xf32> -> vector<16x128xf32>
    %c0_89 = arith.constant 0 : index
    %c0_90 = arith.constant 0 : index
    %311 = vector.load %arg8[%c0_89, %c0_90] : memref<16x128xf32, #tpu.memory_space<vmem>>, vector<16x128xf32>
    tpu.vector_store %arg8[%c0_89, %c0_90], %310 {strides = array<i32>} : memref<16x128xf32, #tpu.memory_space<vmem>>, vector<16x128xf32>,
    return
  }
  func.func @transform_0(%arg0: i32) -> (i32, i32) {
    %c0_i32 = arith.constant 0 : i32
    %c0_i32_0 = arith.constant 0 : i32
    %c0_i32_1 = arith.constant 0 : i32
    return %c0_i32, %c0_i32_0 : i32, i32
  }
  func.func @transform_1(%arg0: i32) -> (i32, i32) {
    %c0_i32 = arith.constant 0 : i32
    %c0_i32_0 = arith.constant 0 : i32
    %c0_i32_1 = arith.constant 0 : i32
    return %c0_i32, %c0_i32_0 : i32, i32
  }
  func.func @transform_2(%arg0: i32) -> (i32, i32, i32) {
    %c0_i32 = arith.constant 0 : i32
    %c0_i32_0 = arith.constant 0 : i32
    %c0_i32_1 = arith.constant 0 : i32
    %c0_i32_2 = arith.constant 0 : i32
    return %c0_i32, %c0_i32_0, %c0_i32_1 : i32, i32, i32
  }
  func.func @transform_3(%arg0: i32) -> (i32, i32) {
    %c0_i32 = arith.constant 0 : i32
    %c0_i32_0 = arith.constant 0 : i32
    %c0_i32_1 = arith.constant 0 : i32
    return %c0_i32, %c0_i32_0 : i32, i32
  }
  func.func @transform_4(%arg0: i32) -> (i32, i32, i32) {
    %c0_i32 = arith.constant 0 : i32
    %c0_i32_0 = arith.constant 0 : i32
    %c0_i32_1 = arith.constant 0 : i32
    %c0_i32_2 = arith.constant 0 : i32
    return %c0_i32, %c0_i32_0, %c0_i32_1 : i32, i32, i32
  }
  func.func @transform_5(%arg0: i32) -> (i32, i32, i32) {
    %c0_i32 = arith.constant 0 : i32
    %c0_i32_0 = arith.constant 0 : i32
    %c0_i32_1 = arith.constant 0 : i32
    %c0_i32_2 = arith.constant 0 : i32
    return %c0_i32, %c0_i32_0, %c0_i32_1 : i32, i32, i32
  }
  func.func @transform_6(%arg0: i32) -> (i32, i32) {
    %c0_i32 = arith.constant 0 : i32
    %c0_i32_0 = arith.constant 0 : i32
    %c0_i32_1 = arith.constant 0 : i32
    return %c0_i32, %c0_i32_0 : i32, i32
  }
  func.func @transform_7(%arg0: i32) -> (i32, i32) {
    %c0_i32 = arith.constant 0 : i32
    %c0_i32_0 = arith.constant 0 : i32
    %c0_i32_1 = arith.constant 0 : i32
    return %c0_i32, %c0_i32_0 : i32, i32
  }
}

</mosaic_0001>

<bundles_post_ra>
// kernel: tile.28
= control target key start
LH: loop header
LB: loop body
LE: loop exit
PB: predicated region body
PF: predicated region fallthrough
CT: control target
= control target key end

     0   :  { %s154_s0 = inlined_call_operand.vmem [shape: f32[8,8], index: 0, kind: input, shape index: {}]   ;;  %s155_s1 = inlined_call_operand.vmem [shape: f32[2,8,2,8], index: 1, kind: output, shape index: {}]  }
   0x1   :  { %v4_v0 = vld [vmem:[%s154_s0] ss:$0 sm:$0xff]  ;;  %v51_v1 = vld [vmem:[%s154_s0 + $0x1] ss:$0 sm:$0xff]  ;;  %v54_v2 = vld [vmem:[%s154_s0 + $0x2] ss:$0 sm:$0xff] }
   0x2   :  { %5 = vst [vmem:[%s155_s1] sm:$0x3] %v4_v0  ;;  %50 = vst [vmem:[%s155_s1 + $0x10] sm:$0x3] %v4_v0  ;;  %v57_v3 = vld [vmem:[%s154_s0 + $0x3] ss:$0 sm:$0xff] }
   0x3   :  { %52 = vst [vmem:[%s155_s1 + $0x2] sm:$0x3] %v51_v1  ;;  %53 = vst [vmem:[%s155_s1 + $0x12] sm:$0x3] %v51_v1  ;;  %v60_v4 = vld [vmem:[%s154_s0 + $0x4] ss:$0 sm:$0xff] }
   0x4   :  { %55 = vst [vmem:[%s155_s1 + $0x4] sm:$0x3] %v54_v2  ;;  %56 = vst [vmem:[%s155_s1 + $0x14] sm:$0x3] %v54_v2  ;;  %v63_v5 = vld [vmem:[%s154_s0 + $0x5] ss:$0 sm:$0xff] }
   0x5   :  { %58 = vst [vmem:[%s155_s1 + $0x6] sm:$0x3] %v57_v3  ;;  %59 = vst [vmem:[%s155_s1 + $0x16] sm:$0x3] %v57_v3  ;;  %v66_v6 = vld [vmem:[%s154_s0 + $0x6] ss:$0 sm:$0xff] }
   0x6   :  { %61 = vst [vmem:[%s155_s1 + $0x8] sm:$0x3] %v60_v4  ;;  %62 = vst [vmem:[%s155_s1 + $0x18] sm:$0x3] %v60_v4  ;;  %v69_v7 = vld [vmem:[%s154_s0 + $0x7] ss:$0 sm:$0xff] }
   0x7   :  { %64 = vst [vmem:[%s155_s1 + $0xa] sm:$0x3] %v63_v5  ;;  %65 = vst [vmem:[%s155_s1 + $0x1a] sm:$0x3] %v63_v5 }
   0x8   :  { %67 = vst [vmem:[%s155_s1 + $0xc] sm:$0x3] %v66_v6  ;;  %68 = vst [vmem:[%s155_s1 + $0x1c] sm:$0x3] %v66_v6 }
   0x9   :  { %70 = vst [vmem:[%s155_s1 + $0xe] sm:$0x3] %v69_v7  ;;  %71 = vst [vmem:[%s155_s1 + $0x1e] sm:$0x3] %v69_v7 }

// kernel: tile.29
= control target key start
LH: loop header
LB: loop body
LE: loop exit
PB: predicated region body
PF: predicated region fallthrough
CT: control target
= control target key end

     0   :  { %vm83_vm0 = vcmask 1047556   ;;  %vm85_vm1 = vcmask 64512   ;;  %vm104_vm2 = vcmask 130112   ;;  %s226_s0 = inlined_call_operand.vmem [shape: f32[2,8,2,8], index: 0, kind: input, shape index: {}]   ;;  %s227_s1 = inlined_call_operand.vmem [shape: f32[16,16], index: 1, kind: output, shape index: {}]  }
   0x1   :  { %v139_v0 = vld [vmem:[%s226_s0 + $0xe] sm:$0x3]  ;;  %v140_v1 = vld [vmem:[%s226_s0 + $0xc] sm:$0x3]  ;;  %v141_v2 = vld [vmem:[%s226_s0 + $0xa] sm:$0x3] }
   0x2   :  { %49 = vst [vmem:[#allocation0 + $0x38] sm:$0x3] %v139_v0  ;;  %54 = vst [vmem:[#allocation0 + $0x30] sm:$0x3] %v140_v1  ;;  %v142_v3 = vld [vmem:[%s226_s0 + $0x8] sm:$0x3] }
   0x3   :  { %59 = vst [vmem:[#allocation0 + $0x28] sm:$0x3] %v141_v2  ;;  %v143_v4 = vld [vmem:[%s226_s0 + $0x6] sm:$0x3]  ;;  %v144_v5 = vld [vmem:[%s226_s0 + $0x4] sm:$0x3] }
   0x4   :  { %64 = vst [vmem:[#allocation0 + $0x20] sm:$0x3] %v142_v3  ;;  %69 = vst [vmem:[#allocation0 + $0x18] sm:$0x3] %v143_v4  ;;  %v145_v6 = vld [vmem:[%s226_s0 + $0x2] sm:$0x3] }
   0x5   :  { %74 = vst [vmem:[#allocation0 + $0x10] sm:$0x3] %v144_v5  ;;  %v79_v7 = vld [vmem:[%s226_s0] sm:$0x3]  ;;  %78 = vst [vmem:[#allocation0 + $0x8] sm:$0x3] %v145_v6 }
   0x6   :  { %80 = vst [vmem:[#allocation0] sm:$0x3] %v79_v7  ;;  %v131_v8 = vld [vmem:[%s226_s0 + $0x1e] sm:$0x3]  ;;  %v132_v9 = vld [vmem:[%s226_s0 + $0x1c] sm:$0x3] }
   0x7   :  { %v133_v10 = vld [vmem:[%s226_s0 + $0x1a] sm:$0x3]  ;;  %9 = vst [vmem:[#allocation0 + $0x78] sm:$0x3] %v131_v8  ;;  %14 = vst [vmem:[#allocation0 + $0x70] sm:$0x3] %v132_v9 }
   0x8   :  { %19 = vst [vmem:[#allocation0 + $0x68] sm:$0x3] %v133_v10  ;;  %v134_v11 = vld [vmem:[%s226_s0 + $0x18] sm:$0x3]  ;;  %v135_v12 = vld [vmem:[%s226_s0 + $0x16] sm:$0x3] }
   0x9   :  { %v136_v13 = vld [vmem:[%s226_s0 + $0x14] sm:$0x3]  ;;  %24 = vst [vmem:[#allocation0 + $0x60] sm:$0x3] %v134_v11  ;;  %29 = vst [vmem:[#allocation0 + $0x58] sm:$0x3] %v135_v12 }
   0xa   :  { %34 = vst [vmem:[#allocation0 + $0x50] sm:$0x3] %v136_v13  ;;  %v137_v14 = vld [vmem:[%s226_s0 + $0x12] sm:$0x3]  ;;  %v138_v15 = vld [vmem:[%s226_s0 + $0x10] sm:$0x3] }
   0xb   :  { %39 = vst [vmem:[#allocation0 + $0x48] sm:$0x3] %v137_v14  ;;  %44 = vst [vmem:[#allocation0 + $0x40] sm:$0x3] %v138_v15  ;;  %s149_s0 = smov 8  }
   0xc   :  { %v99_v16 = vld [vmem:[#allocation0 + $0x1] ss:$8 sm:$0xf0]   ;;  %v82_v17 = vld [vmem:[#allocation0] ss:$8 sm:$0xf0]  }
   0xd   :  { %v97_v18 = vld [vmem:[#allocation0 + $0x1] ss:$8 sm:$0xf]   ;;  %v81_v19 = vld [vmem:[#allocation0] ss:$8 sm:$0xf]  }
   0xe   :  { %v101_v20 = vsel %vm83_vm0, %v99_v16, %v97_v18  ;;  %v84_v21 = vsel %vm83_vm0, %v82_v17, %v81_v19 }
   0xf   :  { %102 = vrot.lane.b32.xlu0 %v101_v20, %s149_s0  ;;  %86 = vst.msk [vmem:[%s227_s1] sm:$0xff] %vm85_vm1, %v84_v21  }
  0x10   :  { %v109_v22 = vld [vmem:[#allocation0 + $0x41] ss:$8 sm:$0xf0]   ;;  %v90_v23 = vld [vmem:[#allocation0 + $0x40] ss:$8 sm:$0xf0]  }
  0x12   :  { %v107_v24 = vld [vmem:[#allocation0 + $0x41] ss:$8 sm:$0xf]   ;;  %v88_v25 = vld [vmem:[#allocation0 + $0x40] ss:$8 sm:$0xf]  }
  0x13   :  { %v111_v26 = vsel %vm83_vm0, %v109_v22, %v107_v24  ;;  %v92_v27 = vsel %vm83_vm0, %v90_v23, %v88_v25 }
  0x14   :  { %146 = vst.msk [vmem:[%s227_s1 + $0x8] sm:$0xff] %vm85_vm1, %v92_v27   ;;  %112 = vrot.lane.b32.xlu0 %v111_v26, %s149_s0 }
  0x81   :  { %v103_v28 = vpop.permute.xlu0 %102  }
  0x82   :  { %105 = vst.msk [vmem:[%s227_s1] sm:$0xff] %vm104_vm2, %v103_v28  }
  0x86   :  { %v113_v29 = vpop.permute.xlu0 %112  }
  0x87   :  { %147 = vst.msk [vmem:[%s227_s1 + $0x8] sm:$0xff] %vm104_vm2, %v113_v29  }

// kernel: tile.33
= control target key start
LH: loop header
LB: loop body
LE: loop exit
PB: predicated region body
PF: predicated region fallthrough
CT: control target
= control target key end

     0   :  { %s154_s0 = inlined_call_operand.vmem [shape: f32[8,8], index: 0, kind: input, shape index: {}]   ;;  %s155_s1 = inlined_call_operand.vmem [shape: f32[2,8,4,8], index: 1, kind: output, shape index: {}]  }
   0x1   :  { %v4_v0 = vld [vmem:[%s154_s0] ss:$0 sm:$0xff]  ;;  %v51_v1 = vld [vmem:[%s154_s0 + $0x1] ss:$0 sm:$0xff]  ;;  %v54_v2 = vld [vmem:[%s154_s0 + $0x2] ss:$0 sm:$0xff] }
   0x2   :  { %5 = vst [vmem:[%s155_s1] sm:$0xf] %v4_v0  ;;  %50 = vst [vmem:[%s155_s1 + $0x20] sm:$0xf] %v4_v0  ;;  %v57_v3 = vld [vmem:[%s154_s0 + $0x3] ss:$0 sm:$0xff] }
   0x3   :  { %52 = vst [vmem:[%s155_s1 + $0x4] sm:$0xf] %v51_v1  ;;  %53 = vst [vmem:[%s155_s1 + $0x24] sm:$0xf] %v51_v1  ;;  %v60_v4 = vld [vmem:[%s154_s0 + $0x4] ss:$0 sm:$0xff] }
   0x4   :  { %55 = vst [vmem:[%s155_s1 + $0x8] sm:$0xf] %v54_v2  ;;  %56 = vst [vmem:[%s155_s1 + $0x28] sm:$0xf] %v54_v2  ;;  %v63_v5 = vld [vmem:[%s154_s0 + $0x5] ss:$0 sm:$0xff] }
   0x5   :  { %58 = vst [vmem:[%s155_s1 + $0xc] sm:$0xf] %v57_v3  ;;  %59 = vst [vmem:[%s155_s1 + $0x2c] sm:$0xf] %v57_v3  ;;  %v66_v6 = vld [vmem:[%s154_s0 + $0x6] ss:$0 sm:$0xff] }
   0x6   :  { %61 = vst [vmem:[%s155_s1 + $0x10] sm:$0xf] %v60_v4  ;;  %62 = vst [vmem:[%s155_s1 + $0x30] sm:$0xf] %v60_v4  ;;  %v69_v7 = vld [vmem:[%s154_s0 + $0x7] ss:$0 sm:$0xff] }
   0x7   :  { %64 = vst [vmem:[%s155_s1 + $0x14] sm:$0xf] %v63_v5  ;;  %65 = vst [vmem:[%s155_s1 + $0x34] sm:$0xf] %v63_v5 }
   0x8   :  { %67 = vst [vmem:[%s155_s1 + $0x18] sm:$0xf] %v66_v6  ;;  %68 = vst [vmem:[%s155_s1 + $0x38] sm:$0xf] %v66_v6 }
   0x9   :  { %70 = vst [vmem:[%s155_s1 + $0x1c] sm:$0xf] %v69_v7  ;;  %71 = vst [vmem:[%s155_s1 + $0x3c] sm:$0xf] %v69_v7 }

// kernel: tile.34
= control target key start
LH: loop header
LB: loop body
LE: loop exit
PB: predicated region body
PF: predicated region fallthrough
CT: control target
= control target key end

     0   :  { %vm83_vm0 = vcmask 1047556   ;;  %vm85_vm1 = vcmask 64512   ;;  %s196_s9 = smov 24   ;;  %s197_s14 = smov 8   ;;  %vm104_vm2 = vcmask 261312   ;;  %vm125_vm3 = vcmask 195712   ;;  %s290_s0 = inlined_call_operand.vmem [shape: f32[2,8,4,8], index: 0, kind: input, shape index: {}]   ;;  %s291_s1 = inlined_call_operand.vmem [shape: f32[16,32], index: 1, kind: output, shape index: {}]  }
   0x1   :  { %v181_v0 = vld [vmem:[%s290_s0 + $0x1c] sm:$0xf]  ;;  %v182_v1 = vld [vmem:[%s290_s0 + $0x18] sm:$0xf]  ;;  %v183_v2 = vld [vmem:[%s290_s0 + $0x14] sm:$0xf] }
   0x2   :  { %49 = vst [vmem:[#allocation0 + $0x38] sm:$0xf] %v181_v0  ;;  %54 = vst [vmem:[#allocation0 + $0x30] sm:$0xf] %v182_v1  ;;  %v184_v3 = vld [vmem:[%s290_s0 + $0x10] sm:$0xf] }
   0x3   :  { %59 = vst [vmem:[#allocation0 + $0x28] sm:$0xf] %v183_v2  ;;  %v185_v4 = vld [vmem:[%s290_s0 + $0xc] sm:$0xf]  ;;  %v186_v5 = vld [vmem:[%s290_s0 + $0x8] sm:$0xf] }
   0x4   :  { %64 = vst [vmem:[#allocation0 + $0x20] sm:$0xf] %v184_v3  ;;  %69 = vst [vmem:[#allocation0 + $0x18] sm:$0xf] %v185_v4  ;;  %v187_v6 = vld [vmem:[%s290_s0 + $0x4] sm:$0xf] }
   0x5   :  { %74 = vst [vmem:[#allocation0 + $0x10] sm:$0xf] %v186_v5  ;;  %v79_v7 = vld [vmem:[%s290_s0] sm:$0xf]  ;;  %78 = vst [vmem:[#allocation0 + $0x8] sm:$0xf] %v187_v6 }
   0x6   :  { %80 = vst [vmem:[#allocation0] sm:$0xf] %v79_v7  ;;  %v173_v8 = vld [vmem:[%s290_s0 + $0x3c] sm:$0xf]  ;;  %v174_v9 = vld [vmem:[%s290_s0 + $0x38] sm:$0xf] }
   0x7   :  { %9 = vst [vmem:[#allocation0 + $0x78] sm:$0xf] %v173_v8  ;;  %14 = vst [vmem:[#allocation0 + $0x70] sm:$0xf] %v174_v9  ;;  %v175_v10 = vld [vmem:[%s290_s0 + $0x34] sm:$0xf] }
   0x8   :  { %v176_v11 = vld [vmem:[%s290_s0 + $0x30] sm:$0xf]  ;;  %v177_v12 = vld [vmem:[%s290_s0 + $0x2c] sm:$0xf]  ;;  %19 = vst [vmem:[#allocation0 + $0x68] sm:$0xf] %v175_v10 }
   0x9   :  { %24 = vst [vmem:[#allocation0 + $0x60] sm:$0xf] %v176_v11  ;;  %29 = vst [vmem:[#allocation0 + $0x58] sm:$0xf] %v177_v12  ;;  %v178_v13 = vld [vmem:[%s290_s0 + $0x28] sm:$0xf] }
   0xa   :  { %v179_v14 = vld [vmem:[%s290_s0 + $0x24] sm:$0xf]  ;;  %v180_v15 = vld [vmem:[%s290_s0 + $0x20] sm:$0xf]  ;;  %34 = vst [vmem:[#allocation0 + $0x50] sm:$0xf] %v178_v13 }
   0xb   :  { %39 = vst [vmem:[#allocation0 + $0x48] sm:$0xf] %v179_v14  ;;  %44 = vst [vmem:[#allocation0 + $0x40] sm:$0xf] %v180_v15  ;;  %s195_s0 = smov 16   ;;  %vm146_vm4 = vcmask 130112  }
   0xc   :  { %v120_v16 = vld [vmem:[#allocation0 + $0x2] ss:$8 sm:$0xf0]   ;;  %v99_v17 = vld [vmem:[#allocation0 + $0x3] ss:$8 sm:$0xf0]  }
   0xd   :  { %v118_v18 = vld [vmem:[#allocation0 + $0x2] ss:$8 sm:$0xf]   ;;  %v97_v19 = vld [vmem:[#allocation0 + $0x3] ss:$8 sm:$0xf]  }
   0xe   :  { %v122_v20 = vsel %vm83_vm0, %v120_v16, %v118_v18  ;;  %v101_v21 = vsel %vm83_vm0, %v99_v17, %v97_v19  ;;  %v139_v24 = vld [vmem:[#allocation0 + $0x1] ss:$8 sm:$0xf]   ;;  %v81_v32 = vld [vmem:[#allocation0] ss:$8 sm:$0xf]  }
   0xf   :  { %123 = vrot.lane.b32.xlu1 %v122_v20, %s195_s0  ;;  %102 = vrot.lane.b32.xlu0 %v101_v21, %s196_s9  ;;  %v141_v25 = vld [vmem:[#allocation0 + $0x1] ss:$8 sm:$0xf0]   ;;  %v82_v33 = vld [vmem:[#allocation0] ss:$8 sm:$0xf0]  }
  0x10   :  { %v130_v22 = vld [vmem:[#allocation0 + $0x42] ss:$8 sm:$0xf0]   ;;  %v109_v23 = vld [vmem:[#allocation0 + $0x43] ss:$8 sm:$0xf0]   ;;  %v84_v34 = vsel %vm83_vm0, %v82_v33, %v81_v32  ;;  %v143_v38 = vsel %vm83_vm0, %v141_v25, %v139_v24 }
  0x11   :  { %v151_v31 = vld [vmem:[#allocation0 + $0x41] ss:$8 sm:$0xf0]   ;;  %v90_v36 = vld [vmem:[#allocation0 + $0x40] ss:$8 sm:$0xf0]  }
  0x12   :  { %v128_v26 = vld [vmem:[#allocation0 + $0x42] ss:$8 sm:$0xf]   ;;  %v107_v27 = vld [vmem:[#allocation0 + $0x43] ss:$8 sm:$0xf]  }
  0x13   :  { %v132_v28 = vsel %vm83_vm0, %v130_v22, %v128_v26  ;;  %v111_v29 = vsel %vm83_vm0, %v109_v23, %v107_v27  ;;  %v149_v30 = vld [vmem:[#allocation0 + $0x41] ss:$8 sm:$0xf]   ;;  %v88_v35 = vld [vmem:[#allocation0 + $0x40] ss:$8 sm:$0xf]  }
  0x14   :  { %133 = vrot.lane.b32.xlu1 %v132_v28, %s195_s0  ;;  %112 = vrot.lane.b32.xlu0 %v111_v29, %s196_s9  ;;  %v153_v37 = vsel %vm83_vm0, %v151_v31, %v149_v30  ;;  %86 = vst.msk [vmem:[%s291_s1] sm:$0xff] %vm85_vm1, %v84_v34   ;;  %v92_v39 = vsel %vm83_vm0, %v90_v36, %v88_v35 }
  0x15   :  { %188 = vst.msk [vmem:[%s291_s1 + $0x8] sm:$0xff] %vm85_vm1, %v92_v39  }
  0x18   :  { %154 = vrot.lane.b32.xlu1 %v153_v37, %s197_s14  ;;  %144 = vrot.lane.b32.xlu0 %v143_v38, %s197_s14 }
  0x81   :  { %v124_v40 = vpop.permute.xlu1 %123   ;;  %v103_v41 = vpop.permute.xlu0 %102  }
  0x82   :  { %105 = vst.msk [vmem:[%s291_s1] sm:$0xff] %vm104_vm2, %v103_v41  }
  0x83   :  { %126 = vst.msk [vmem:[%s291_s1] sm:$0xff] %vm125_vm3, %v124_v40  }
  0x86   :  { %v134_v42 = vpop.permute.xlu1 %133   ;;  %v113_v43 = vpop.permute.xlu0 %112  }
  0x87   :  { %189 = vst.msk [vmem:[%s291_s1 + $0x8] sm:$0xff] %vm104_vm2, %v113_v43  }
  0x88   :  { %190 = vst.msk [vmem:[%s291_s1 + $0x8] sm:$0xff] %vm125_vm3, %v134_v42  }
  0x8a   :  { %v155_v44 = vpop.permute.xlu1 %154   ;;  %v145_v45 = vpop.permute.xlu0 %144  }
  0x8b   :  { %191 = vst.msk [vmem:[%s291_s1 + $0x8] sm:$0xff] %vm146_vm4, %v155_v44   ;;  %147 = vst.msk [vmem:[%s291_s1] sm:$0xff] %vm146_vm4, %v145_v45  }

// kernel: mistral_forward.1
= control target key start
LH: loop header
LB: loop body
LE: loop exit
PB: predicated region body
PF: predicated region fallthrough
CT: control target
= control target key end

     0   :  { %vm59_vm0 = vcmask 261120   ;;  %v2344_v6 = vmov 0.0   ;;  %vm2345_vm1 = vmmov 0   ;;  %s2346_s10 = smov 64   ;;  %v75_v17 = vlaneseq  ;;  %s2347_s19 = smov 96   ;;  %s2811_s0 = inlined_call_operand.vmem [shape: f32[16,32], index: 0, kind: input, shape index: {}]   ;;  %s2812_s4 = inlined_call_operand.vmem [shape: bf16[2,64,128], index: 4, kind: input, shape index: {}]   ;;  %s2813_s2 = inlined_call_operand.vmem [shape: f32[2,16,48], index: 2, kind: input, shape index: {}]   ;;  %s2814_s3 = inlined_call_operand.vmem [shape: f32[5,32], index: 3, kind: input, shape index: {}]   ;;  %s2815_s1 = inlined_call_operand.vmem [shape: f32[16,16], index: 1, kind: input, shape index: {}]   ;;  %s2816_s5 = inlined_call_operand.vmem [shape: bf16[2,96,32], index: 5, kind: input, shape index: {}]   ;;  %s2817_s6 = inlined_call_operand.vmem [shape: bf16[32,128], index: 6, kind: input, shape index: {}]   ;;  %s2818_s7 = inlined_call_operand.vmem [shape: f32[16,128], index: 7, kind: output, shape index: {}]  }
   0x1   :  { %v2400_v0 = vld [vmem:[%s2811_s0] sm:$0xff]  ;;  %v2405_v1 = vld [vmem:[%s2811_s0 + $0x8] sm:$0xff]  ;;  %2002 = vmatprep.subr.bf16.mxu0 %v2344_v6  ;;  %2006 = vmatprep.mubr.msk.bf16.mxu0 %vm2345_vm1, %v2344_v6  ;;  %v1866_v9 = vld [vmem:[%s2813_s2 + $0x10] sm:$0xff]  ;;  %s2348_s20 = smov 120   ;;  %s2349_s21 = smov 88   ;;  %vm164_vm2 = vcmask 64512  }
   0x2   :  { %v57_v2 = vmul.f32 %v2400_v0, %v2400_v0  ;;  %v58_v3 = vmul.f32 %v2405_v1, %v2405_v1  ;;  %v2221_v7 = vld [vmem:[%s2812_s4 + $0x8] sm:$0xff]   ;;  %2010 = vmatprep.subr.bf16.mxu1 %v2344_v6  ;;  %2012 = vmatprep.mubr.msk.bf16.mxu1 %vm2345_vm1, %v2344_v6  ;;  %v2222_v8 = vld [vmem:[%s2812_s4] sm:$0xff]   ;;  %v1867_v10 = vld [vmem:[%s2813_s2 + $0x18] sm:$0xff]  ;;  %v2435_v18 = vshrl.u32 %v75_v17, 7  ;;  %s2351_s22 = smov 104   ;;  %vm216_vm3 = vcmask 130048  }
   0x3   :  { %2003 = vmatpush3.bf16.msra.mxu0 %v2221_v7  ;;  %142 = vrot.lane.b32.xlu1 %v1866_v9, %s2346_s10  ;;  %v2441_v21 = vld [vmem:[%s2814_s3] sm:$0x1f]  ;;  %v2467_v39 = vld [vmem:[%s2813_s2 + $0x8] sm:$0xff]  ;;  %s2353_s27 = smov 72   ;;  %s2354_s0 = smov 8   ;;  %vm676_vm4 = vcmask 195584  }
   0x4   :  { %v60_v4 = vsel %vm59_vm0, %v57_v2, 0.0  ;;  %v63_v5 = vsel %vm59_vm0, %v58_v3, 0.0  ;;  %2004 = vmatprep.subr.bf16.mxu0 %v2344_v6  ;;  %v77_v19 = vsub.s32 0, %v2435_v18  ;;  %v2462_v38 = vld [vmem:[%s2813_s2] sm:$0xff]  ;;  %s2350_s2 = smov 112   ;;  %v2503_v60 = vld [vmem:[%s2815_s1 + $0x8] sm:$0xff] }
   0x5   :  { %61 = vadd.xlane.f32.xlu0 %v60_v4  ;;  %v2497_v55 = vld [vmem:[%s2815_s1] sm:$0xff]  ;;  %s2352_s1 = smov 80   ;;  %s2355_s9 = smov 16   ;;  %vm866_vm5 = vcmask 523264  }
   0x6   :  { %v78_v23 = vrot.slane %v2441_v21, %v77_v19  ;;  %s2356_s11 = smov 24  }
   0x7   :  { %2005 = vmatpush3.bf16.msra.mxu0 %v2222_v8  ;;  %144 = vrot.lane.b32.xlu1 %v1867_v10, %s2346_s10 }
   0x8   :  { %2016 = vmatprep.subr.bf16.mxu0 %v2344_v6 }
   0x9   :  { %64 = vadd.xlane.f32.xlu0 %v63_v5 }
  0x75   :  { %v2449_v29 = vpop.permute.xlu1 %142 }
  0x79   :  { %v2452_v33 = vpop.permute.xlu1 %144 }
  0x8e   :  { %v62_v11 = vpop.xlane.xlu0 %61 }
  0x8f   :  { %v67_v12 = vmul.f32 0.03125, %v62_v11 }
  0x91   :  { %v69_v13 = vadd.f32 1e-06, %v67_v12 }
  0x92   :  { %v65_v14 = vpop.xlane.xlu0 %64 }
  0x93   :  { %2243 = vrsqrt.f32 %v69_v13  ;;  %v68_v15 = vmul.f32 0.03125, %v65_v14 }
  0x95   :  { %v70_v16 = vadd.f32 1e-06, %v68_v15 }
  0x97   :  { %2245 = vrsqrt.f32 %v70_v16 }
  0xa0   :  { %v2244_v20 = vpop.eup %2243 }
  0xa1   :  { %v73_v22 = vmul.f32 %v2244_v20, %v2400_v0 }
  0xa3   :  { %v79_v26 = vmul.f32 %v78_v23, %v73_v22 }
  0xa4   :  { %v2246_v24 = vpop.eup %2245 }
  0xa5   :  { %v74_v25 = vmul.f32 %v2246_v24, %v2405_v1 }
  0xa7   :  { %v80_v27 = vmul.f32 %v78_v23, %v74_v25 }
  0xa9   :  { %v81_v28 = vpack.c.bf16 %v80_v27, %v79_v26 }
  0xab   :  { %2007 = vmatmul.mubr.msk.bf16.vlgmr.msra.gmra.mxu0 %vm59_vm0, %v81_v28 }
  0xac   :  { %2018 = vmatprep.mubr.msk.bf16.mxu0 %vm2345_vm1, %v2344_v6 }
 0x16b   :  { %v131_v30 = vpop.f32.mrf.mxu0 }
 0x16c   :  { %v148_v31 = vmul.f32 %v2449_v29, %v131_v30  ;;  %v138_v41 = vmul.f32 %v131_v30, %v2462_v38 }
 0x16d   :  { %v2008_v32 = vpop.f32.mrf.mxu0 }
 0x16e   :  { %152 = vrot.lane.b32.xlu0 %v148_v31, %s2346_s10 }
 0x16f   :  { %v134_v34 = vpop.f32.mrf.mxu0 }
 0x170   :  { %v149_v35 = vmul.f32 %v2452_v33, %v134_v34  ;;  %v2456_v36 = vpack.c.bf16 %v134_v34, %v131_v30  ;;  %v139_v42 = vmul.f32 %v134_v34, %v2467_v39 }
 0x171   :  { %v2009_v37 = vpop.f32.mrf.mxu0 }
 0x172   :  { %154 = vrot.lane.b32.xlu1 %v149_v35, %s2346_s10 }
 0x1e0   :  { %v153_v40 = vpop.permute.xlu0 %152 }
 0x1e1   :  { %v158_v44 = vadd.f32 %v153_v40, %v138_v41 }
 0x1e4   :  { %v155_v43 = vpop.permute.xlu1 %154 }
 0x1e5   :  { %v159_v45 = vadd.f32 %v155_v43, %v139_v42 }
 0x1e7   :  { %v160_v46 = vpack.c.bf16 %v159_v45, %v158_v44 }
 0x1e9   :  { %162 = vrot.lane.b32.xlu1 %v160_v46, %s2347_s19 }
 0x1ed   :  { %289 = vrot.lane.b32.xlu1 %v160_v46, %s2348_s20 }
 0x1f1   :  { %408 = vrot.lane.b32.xlu1 %v160_v46, %s2349_s21 }
 0x1f5   :  { %406 = vrot.lane.b32.xlu1 %v160_v46, %s2350_s2 }
 0x1f9   :  { %531 = vrot.lane.b32.xlu1 %v160_v46, %s2351_s22 }
 0x25b   :  { %v163_v47 = vpop.permute.xlu1 %162 }
 0x25c   :  { %v169_v48 = vsel %vm164_vm2, %v163_v47, 0 }
 0x25d   :  { %2011 = vmatpush3.bf16.xpose.msra.mxu1 %v169_v48 }
 0x25e   :  { %2022 = vmatprep.subr.bf16.mxu1 %v2344_v6 }
 0x25f   :  { %v290_v49 = vpop.permute.xlu1 %289 }
 0x263   :  { %v409_v50 = vpop.permute.xlu1 %408 }
 0x264   :  { %2013 = vmatmul.mubr.msk.bf16.vlgmr.msra.gmra.mxu1 %vm164_vm2, %v160_v46  ;;  %v414_v51 = vsel %vm164_vm2, %v409_v50, 0 }
 0x265   :  { %2023 = vmatpush3.bf16.xpose.msra.mxu1 %v169_v48  ;;  %2024 = vmatprep.mubr.msk.bf16.mxu1 %vm2345_vm1, %v2344_v6 }
 0x266   :  { %2034 = vmatprep.subr.bf16.mxu1 %v2344_v6 }
 0x267   :  { %v407_v52 = vpop.permute.xlu1 %406 }
 0x26b   :  { %v532_v53 = vpop.permute.xlu1 %531 }
 0x26c   :  { %2025 = vmatmul.mubr.msk.bf16.vlgmr.msra.gmra.mxu1 %vm164_vm2, %v290_v49 }
 0x26d   :  { %2035 = vmatpush3.bf16.xpose.msra.mxu1 %v414_v51  ;;  %2036 = vmatprep.mubr.msk.bf16.mxu1 %vm2345_vm1, %v2344_v6 }
 0x26e   :  { %2046 = vmatprep.subr.bf16.mxu1 %v2344_v6 }
 0x274   :  { %2037 = vmatmul.mubr.msk.bf16.vlgmr.msra.gmra.mxu1 %vm164_vm2, %v407_v52 }
 0x275   :  { %2047 = vmatpush3.bf16.xpose.msra.mxu1 %v414_v51  ;;  %2048 = vmatprep.mubr.msk.bf16.mxu1 %vm2345_vm1, %v2344_v6 }
 0x276   :  { %2058 = vmatprep.subr.bf16.mxu1 %v2344_v6 }
 0x27c   :  { %2049 = vmatmul.mubr.msk.bf16.vlgmr.msra.gmra.mxu1 %vm164_vm2, %v532_v53 }
 0x27d   :  { %2062 = vmatprep.mubr.msk.bf16.mxu1 %vm2345_vm1, %v2344_v6 }
 0x324   :  { %v205_v54 = vpop.f32.mrf.mxu1 }
 0x325   :  { %v212_v56 = vmul.f32 0.35355338, %v205_v54 }
 0x326   :  { %v2014_v57 = vpop.f32.mrf.mxu1 }
 0x327   :  { %v214_v58 = vadd.f32 %v212_v56, %v2497_v55 }
 0x328   :  { %v208_v59 = vpop.f32.mrf.mxu1 }
 0x329   :  { %v213_v61 = vmul.f32 0.35355338, %v208_v59  ;;  %v217_v62 = vsel %vm216_vm3, %v214_v58, -inf }
 0x32a   :  { %218 = vmax.xlane.f32.xlu0 %v217_v62  ;;  %v2015_v63 = vpop.f32.mrf.mxu1 }
 0x32b   :  { %v215_v2 = vadd.f32 %v213_v61, %v2503_v60 }
 0x32c   :  { %v328_v3 = vpop.f32.mrf.mxu1 }
 0x32d   :  { %v335_v4 = vmul.f32 0.35355338, %v328_v3  ;;  %v220_v5 = vsel %vm216_vm3, %v215_v2, -inf }
 0x32e   :  { %221 = vmax.xlane.f32.xlu1 %v220_v5  ;;  %v2026_v7 = vpop.f32.mrf.mxu1 }
 0x32f   :  { %v337_v8 = vadd.f32 %v335_v4, %v2497_v55 }
 0x330   :  { %v331_v9 = vpop.f32.mrf.mxu1 }
 0x331   :  { %v336_v10 = vmul.f32 0.35355338, %v331_v9  ;;  %v339_v11 = vsel %vm216_vm3, %v337_v8, -inf }
 0x332   :  { %340 = vmax.xlane.f32.xlu0 %v339_v11  ;;  %v2027_v12 = vpop.f32.mrf.mxu1 }
 0x333   :  { %v338_v13 = vadd.f32 %v336_v10, %v2503_v60 }
 0x334   :  { %v450_v14 = vpop.f32.mrf.mxu1 }
 0x335   :  { %v457_v15 = vmul.f32 0.35355338, %v450_v14  ;;  %v342_v16 = vsel %vm216_vm3, %v338_v13, -inf }
 0x336   :  { %343 = vmax.xlane.f32.xlu0 %v342_v16  ;;  %v2038_v17 = vpop.f32.mrf.mxu1 }
 0x337   :  { %v459_v19 = vadd.f32 %v457_v15, %v2497_v55 }
 0x338   :  { %v453_v20 = vpop.f32.mrf.mxu1 }
 0x339   :  { %v458_v22 = vmul.f32 0.35355338, %v453_v20  ;;  %v461_v23 = vsel %vm216_vm3, %v459_v19, -inf }
 0x33a   :  { %462 = vmax.xlane.f32.xlu1 %v461_v23  ;;  %v2039_v24 = vpop.f32.mrf.mxu1 }
 0x33b   :  { %v460_v25 = vadd.f32 %v458_v22, %v2503_v60 }
 0x33c   :  { %v570_v26 = vpop.f32.mrf.mxu1 }
 0x33d   :  { %v577_v27 = vmul.f32 0.35355338, %v570_v26  ;;  %v464_v28 = vsel %vm216_vm3, %v460_v25, -inf }
 0x33e   :  { %465 = vmax.xlane.f32.xlu0 %v464_v28  ;;  %v2050_v30 = vpop.f32.mrf.mxu1 }
 0x33f   :  { %v579_v31 = vadd.f32 %v577_v27, %v2497_v55 }
 0x340   :  { %v573_v32 = vpop.f32.mrf.mxu1 }
 0x341   :  { %v578_v34 = vmul.f32 0.35355338, %v573_v32  ;;  %v581_v35 = vsel %vm216_vm3, %v579_v31, -inf }
 0x342   :  { %582 = vmax.xlane.f32.xlu1 %v581_v35  ;;  %v2051_v37 = vpop.f32.mrf.mxu1 }
 0x343   :  { %v580_v40 = vadd.f32 %v578_v34, %v2503_v60 }
 0x345   :  { %v584_v41 = vsel %vm216_vm3, %v580_v40, -inf }
 0x346   :  { %585 = vmax.xlane.f32.xlu0 %v584_v41 }
 0x353   :  { %238 = vrot.lane.b32.xlu1 %v2456_v36, %s2352_s1 }
 0x35c   :  { %480 = vrot.lane.b32.xlu0 %v2456_v36, %s2353_s27 }
 0x3b3   :  { %v219_v42 = vpop.xlane.xlu0 %218 }
 0x3b4   :  { %v223_v45 = vsub.f32 %v214_v58, %v219_v42 }
 0x3b6   :  { %v225_v50 = vmul.f32 1.442695, %v223_v45 }
 0x3b7   :  { %v222_v43 = vpop.xlane.xlu1 %221 }
 0x3b8   :  { %v224_v44 = vsub.f32 %v215_v2, %v222_v43 }
 0x3ba   :  { %v227_v48 = vmul.f32 1.442695, %v224_v44 }
 0x3bb   :  { %v341_v46 = vpop.xlane.xlu0 %340 }
 0x3bc   :  { %v345_v47 = vsub.f32 %v337_v8, %v341_v46 }
 0x3be   :  { %v347_v49 = vmul.f32 1.442695, %v345_v47 }
 0x3bf   :  { %v344_v51 = vpop.xlane.xlu0 %343 }
 0x3c0   :  { %2247 = vpow2.f32 %v347_v49  ;;  %v346_v52 = vsub.f32 %v338_v13, %v344_v51 }
 0x3c1   :  { %2249 = vpow2.f32 %v227_v48 }
 0x3c2   :  { %v349_v53 = vmul.f32 1.442695, %v346_v52  ;;  %2251 = vpow2.f32 %v225_v50 }
 0x3c3   :  { %v463_v54 = vpop.xlane.xlu1 %462 }
 0x3c4   :  { %2253 = vpow2.f32 %v349_v53  ;;  %v467_v56 = vsub.f32 %v459_v19, %v463_v54  ;;  %v2223_v54 = vld [vmem:[%s2816_s5 + $0x8] sm:$0xff]  }
 0x3c5   :  { %2059 = vmatpush3.bf16.msra.mxu1 %v2223_v54 }
 0x3c6   :  { %v469_v57 = vmul.f32 1.442695, %v467_v56  ;;  %2060 = vmatprep.subr.bf16.mxu1 %v2344_v6 }
 0x3c7   :  { %v466_v36 = vpop.xlane.xlu0 %465 }
 0x3c8   :  { %2255 = vpow2.f32 %v469_v57  ;;  %v468_v59 = vsub.f32 %v460_v25, %v466_v36 }
 0x3ca   :  { %v471_v61 = vmul.f32 1.442695, %v468_v59 }
 0x3cb   :  { %v583_v58 = vpop.xlane.xlu1 %582 }
 0x3cc   :  { %2257 = vpow2.f32 %v471_v61  ;;  %v587_v62 = vsub.f32 %v579_v31, %v583_v58 }
 0x3cd   :  { %v2248_v63 = vpop.eup %2247 }
 0x3ce   :  { %v2250_v2 = vpop.eup %2249  ;;  %v589_v3 = vmul.f32 1.442695, %v587_v62  ;;  %v351_v4 = vsel %vm216_vm3, %v2248_v63, 0.0 }
 0x3cf   :  { %352 = vadd.xlane.f32.xlu1 %v351_v4  ;;  %v586_v5 = vpop.xlane.xlu0 %585  ;;  %v239_v7 = vpop.permute.xlu1 %238  ;;  %v232_v28 = vsel %vm216_vm3, %v2250_v2, 0.0 }
 0x3d0   :  { %v2252_v8 = vpop.eup %2251  ;;  %2259 = vpow2.f32 %v589_v3  ;;  %v588_v9 = vsub.f32 %v580_v40, %v586_v5  ;;  %2017 = vmatpush3.bf16.msra.mxu0 %v239_v7 }
 0x3d1   :  { %v2254_v10 = vpop.eup %2253  ;;  %v235_v11 = vpack.c.bf16 %v2250_v2, %v2252_v8  ;;  %2028 = vmatprep.subr.bf16.mxu0 %v2344_v6  ;;  %v229_v26 = vsel %vm216_vm3, %v2252_v8, 0.0 }
 0x3d2   :  { %v591_v12 = vmul.f32 1.442695, %v588_v9  ;;  %v354_v13 = vsel %vm216_vm3, %v2254_v10, 0.0  ;;  %v357_v17 = vpack.c.bf16 %v2254_v10, %v2248_v63  ;;  %v2224_v63 = vld [vmem:[%s2816_s5] sm:$0xff]  }
 0x3d3   :  { %355 = vadd.xlane.f32.xlu0 %v354_v13  ;;  %2019 = vmatmul.mubr.msk.bf16.vlgmr.msra.gmra.mxu0 %vm216_vm3, %v235_v11  ;;  %v481_v20 = vpop.permute.xlu0 %480 }
 0x3d4   :  { %2261 = vpow2.f32 %v591_v12  ;;  %2029 = vmatpush3.bf16.msra.mxu0 %v239_v7  ;;  %2030 = vmatprep.mubr.msk.bf16.mxu0 %vm2345_vm1, %v2344_v6 }
 0x3d5   :  { %v2256_v14 = vpop.eup %2255  ;;  %2040 = vmatprep.subr.bf16.mxu0 %v2344_v6  ;;  %2061 = vmatpush3.bf16.msra.mxu1 %v2224_v63 }
 0x3d6   :  { %v473_v15 = vsel %vm216_vm3, %v2256_v14, 0.0  ;;  %2074 = vmatprep.subr.bf16.mxu1 %v2344_v6 }
 0x3d7   :  { %474 = vadd.xlane.f32.xlu1 %v473_v15 }
 0x3d9   :  { %v2258_v16 = vpop.eup %2257 }
 0x3da   :  { %v476_v19 = vsel %vm216_vm3, %v2258_v16, 0.0  ;;  %v479_v27 = vpack.c.bf16 %v2258_v16, %v2256_v14 }
 0x3db   :  { %477 = vadd.xlane.f32.xlu0 %v476_v19  ;;  %2031 = vmatmul.mubr.msk.bf16.vlgmr.msra.gmra.mxu0 %vm216_vm3, %v357_v17 }
 0x3dc   :  { %2041 = vmatpush3.bf16.msra.mxu0 %v481_v20  ;;  %2042 = vmatprep.mubr.msk.bf16.mxu0 %vm2345_vm1, %v2344_v6 }
 0x3dd   :  { %v2260_v22 = vpop.eup %2259  ;;  %2052 = vmatprep.subr.bf16.mxu0 %v2344_v6 }
 0x3de   :  { %v593_v23 = vsel %vm216_vm3, %v2260_v22, 0.0 }
 0x3df   :  { %594 = vadd.xlane.f32.xlu1 %v593_v23 }
 0x3e1   :  { %v2262_v24 = vpop.eup %2261 }
 0x3e2   :  { %v596_v25 = vsel %vm216_vm3, %v2262_v24, 0.0  ;;  %v599_v30 = vpack.c.bf16 %v2262_v24, %v2260_v22 }
 0x3e3   :  { %597 = vadd.xlane.f32.xlu0 %v596_v25  ;;  %230 = vadd.xlane.f32.xlu1 %v229_v26 }
 0x3e4   :  { %2043 = vmatmul.mubr.msk.bf16.vlgmr.msra.gmra.mxu0 %vm216_vm3, %v479_v27 }
 0x3e5   :  { %2053 = vmatpush3.bf16.msra.mxu0 %v481_v20  ;;  %2054 = vmatprep.mubr.msk.bf16.mxu0 %vm2345_vm1, %v2344_v6 }
 0x3e6   :  { %2066 = vmatprep.subr.bf16.mxu0 %v2344_v6 }
 0x3e7   :  { %233 = vadd.xlane.f32.xlu0 %v232_v28 }
 0x3ec   :  { %2055 = vmatmul.mubr.msk.bf16.vlgmr.msra.gmra.mxu0 %vm216_vm3, %v599_v30 }
 0x3ed   :  { %2070 = vmatprep.mubr.msk.bf16.mxu0 %vm2345_vm1, %v2344_v6 }
 0x458   :  { %v353_v31 = vpop.xlane.xlu1 %352 }
 0x459   :  { %2263 = vrcp.f32 %v353_v31 }
 0x45c   :  { %v356_v32 = vpop.xlane.xlu0 %355 }
 0x45d   :  { %2265 = vrcp.f32 %v356_v32 }
 0x460   :  { %v475_v37 = vpop.xlane.xlu1 %474 }
 0x461   :  { %2267 = vrcp.f32 %v475_v37 }
 0x464   :  { %v478_v41 = vpop.xlane.xlu0 %477 }
 0x465   :  { %2269 = vrcp.f32 %v478_v41 }
 0x466   :  { %v2264_v45 = vpop.eup %2263 }
 0x468   :  { %v595_v47 = vpop.xlane.xlu1 %594 }
 0x469   :  { %2271 = vrcp.f32 %v595_v47 }
 0x46a   :  { %v2266_v46 = vpop.eup %2265 }
 0x46c   :  { %v598_v49 = vpop.xlane.xlu0 %597  ;;  %v231_v14 = vpop.xlane.xlu1 %230 }
 0x46d   :  { %2273 = vrcp.f32 %v598_v49 }
 0x46e   :  { %v2268_v36 = vpop.eup %2267  ;;  %2275 = vrcp.f32 %v231_v14 }
 0x470   :  { %v234_v15 = vpop.xlane.xlu0 %233 }
 0x471   :  { %2277 = vrcp.f32 %v234_v15 }
 0x472   :  { %v2270_v59 = vpop.eup %2269 }
 0x476   :  { %v2272_v7 = vpop.eup %2271 }
 0x47a   :  { %v2274_v8 = vpop.eup %2273 }
 0x47b   :  { %v2276_v19 = vpop.eup %2275 }
 0x47e   :  { %v2278_v23 = vpop.eup %2277 }
 0x493   :  { %v2548_v34 = vpop.f32.mrf.mxu0 }
 0x494   :  { %v286_v26 = vmul.f32 %v2276_v19, %v2548_v34 }
 0x495   :  { %v2020_v35 = vpop.f32.mrf.mxu0 }
 0x497   :  { %v281_v40 = vpop.f32.mrf.mxu0 }
 0x498   :  { %v288_v27 = vmul.f32 %v2278_v23, %v281_v40 }
 0x499   :  { %v2021_v42 = vpop.f32.mrf.mxu0 }
 0x49b   :  { %v395_v43 = vpop.f32.mrf.mxu0 }
 0x49c   :  { %v403_v50 = vmul.f32 %v2264_v45, %v395_v43 }
 0x49d   :  { %v2032_v44 = vpop.f32.mrf.mxu0 }
 0x49f   :  { %v398_v48 = vpop.f32.mrf.mxu0 }
 0x4a0   :  { %v405_v51 = vmul.f32 %v2266_v46, %v398_v48 }
 0x4a1   :  { %v2033_v52 = vpop.f32.mrf.mxu0 }
 0x4a2   :  { %v2191_v53 = vpack.i.bf16 %v405_v51, %v403_v50 }
 0x4a4   :  { %v520_v56 = vpop.f32.mrf.mxu0  ;;  %2192 = vrot.lane.b32.xlu1 %v2191_v53, %s2354_s0 }
 0x4a5   :  { %v528_v58 = vmul.f32 %v2268_v36, %v520_v56 }
 0x4a6   :  { %v2044_v57 = vpop.f32.mrf.mxu0 }
 0x4a8   :  { %v523_v61 = vpop.f32.mrf.mxu0 }
 0x4a9   :  { %v530_v62 = vmul.f32 %v2270_v59, %v523_v61  ;;  %v756_v61 = vsub.s32 1, %v2435_v18 }
 0x4aa   :  { %v2045_v2 = vpop.f32.mrf.mxu0 }
 0x4ab   :  { %v2196_v3 = vpack.i.bf16 %v530_v62, %v528_v58  ;;  %v757_v63 = vrot.slane %v2441_v21, %v756_v61 }
 0x4ac   :  { %v637_v4 = vpop.f32.mrf.mxu0 }
 0x4ad   :  { %2197 = vrot.lane.b32.xlu0 %v2196_v3, %s2355_s9  ;;  %v645_v10 = vmul.f32 %v2272_v7, %v637_v4 }
 0x4ae   :  { %v2056_v5 = vpop.f32.mrf.mxu0 }
 0x4b0   :  { %v640_v9 = vpop.f32.mrf.mxu0 }
 0x4b1   :  { %v647_v11 = vmul.f32 %v2274_v8, %v640_v9  ;;  %v2227_v8 = vld [vmem:[%s2816_s5 + $0x28] sm:$0xff]   ;;  %v2228_v9 = vld [vmem:[%s2816_s5 + $0x20] sm:$0xff]  }
 0x4b2   :  { %v2057_v12 = vpop.f32.mrf.mxu0 }
 0x4b3   :  { %v2201_v13 = vpack.i.bf16 %v647_v11, %v645_v10  ;;  %v2229_v10 = vld [vmem:[%s2816_s5 + $0x18] sm:$0xff]   ;;  %v2230_v11 = vld [vmem:[%s2816_s5 + $0x10] sm:$0xff]  }
 0x4b5   :  { %2202 = vrot.lane.b32.xlu1 %v2201_v13, %s2356_s11 }
 0x516   :  { %v2193_v16 = vpop.permute.xlu1 %2192 }
 0x517   :  { %v2195_v20 = vunpack.i.h.bf16 %v2193_v16  ;;  %v2194_v22 = vunpack.i.l.bf16 %v2193_v16 }
 0x519   :  { %v673_v30 = vsel %vm164_vm2, %v288_v27, %v2195_v20  ;;  %v672_v31 = vsel %vm164_vm2, %v286_v26, %v2194_v22 }
 0x51f   :  { %v2198_v17 = vpop.permute.xlu0 %2197 }
 0x520   :  { %v2200_v24 = vunpack.i.h.bf16 %v2198_v17  ;;  %v2199_v25 = vunpack.i.l.bf16 %v2198_v17 }
 0x522   :  { %v675_v37 = vsel %vm216_vm3, %v673_v30, %v2200_v24  ;;  %v674_v41 = vsel %vm216_vm3, %v672_v31, %v2199_v25 }
 0x527   :  { %v2203_v28 = vpop.permute.xlu1 %2202 }
 0x528   :  { %v2205_v32 = vunpack.i.h.bf16 %v2203_v28  ;;  %v2204_v35 = vunpack.i.l.bf16 %v2203_v28 }
 0x52a   :  { %v678_v42 = vsel %vm676_vm4, %v675_v37, %v2205_v32  ;;  %v677_v43 = vsel %vm676_vm4, %v674_v41, %v2204_v35 }
 0x52b   :  { %v679_v44 = vpack.c.bf16 %v678_v42, %v677_v43 }
 0x52d   :  { %2063 = vmatmul.mubr.msk.bf16.vlgmr.msra.gmra.mxu1 %vm59_vm0, %v679_v44 }
 0x52e   :  { %2082 = vmatprep.mubr.msk.bf16.mxu1 %vm2345_vm1, %v2344_v6  ;;  %2075 = vmatpush3.bf16.msra.mxu1 %v2227_v8 }
 0x52f   :  { %2076 = vmatprep.subr.bf16.mxu1 %v2344_v6 }
 0x532   :  { %2077 = vmatpush3.bf16.msra.mxu1 %v2228_v9 }
 0x533   :  { %2078 = vmatprep.subr.bf16.mxu1 %v2344_v6 }
 0x536   :  { %2079 = vmatpush3.bf16.msra.mxu1 %v2229_v10 }
 0x537   :  { %2080 = vmatprep.subr.bf16.mxu1 %v2344_v6 }
 0x53a   :  { %2081 = vmatpush3.bf16.msra.mxu1 %v2230_v11 }
 0x53b   :  { %2100 = vmatprep.subr.bf16.mxu1 %v2344_v6 }
 0x5ed   :  { %v729_v34 = vpop.f32.mrf.mxu1 }
 0x5ee   :  { %v2572_v40 = vadd.f32 %v729_v34, %v2400_v0  ;;  %v2225_v0 = vld [vmem:[%s2812_s4 + $0x18] sm:$0xff]  }
 0x5ef   :  { %v2064_v45 = vpop.f32.mrf.mxu1  ;;  %2067 = vmatpush3.bf16.msra.mxu0 %v2225_v0 }
 0x5f0   :  { %v738_v46 = vmul.f32 %v2572_v40, %v2572_v40  ;;  %2068 = vmatprep.subr.bf16.mxu0 %v2344_v6 }
 0x5f1   :  { %v732_v47 = vpop.f32.mrf.mxu1 }
 0x5f2   :  { %v2577_v48 = vadd.f32 %v732_v47, %v2405_v1  ;;  %v740_v49 = vsel %vm59_vm0, %v738_v46, 0.0  ;;  %v2226_v1 = vld [vmem:[%s2812_s4 + $0x10] sm:$0xff]  }
 0x5f3   :  { %741 = vadd.xlane.f32.xlu1 %v740_v49  ;;  %v2065_v50 = vpop.f32.mrf.mxu1  ;;  %2069 = vmatpush3.bf16.msra.mxu0 %v2226_v1 }
 0x5f4   :  { %v739_v51 = vmul.f32 %v2577_v48, %v2577_v48  ;;  %2086 = vmatprep.subr.bf16.mxu0 %v2344_v6 }
 0x5f6   :  { %v743_v52 = vsel %vm59_vm0, %v739_v51, 0.0 }
 0x5f7   :  { %744 = vadd.xlane.f32.xlu0 %v743_v52 }
 0x67c   :  { %v742_v53 = vpop.xlane.xlu1 %741 }
 0x67d   :  { %v746_v54 = vmul.f32 0.03125, %v742_v53 }
 0x67f   :  { %v748_v56 = vadd.f32 1e-06, %v746_v54  ;;  %v953_v54 = vsub.s32 2, %v2435_v18 }
 0x680   :  { %v745_v57 = vpop.xlane.xlu0 %744 }
 0x681   :  { %2279 = vrsqrt.f32 %v748_v56  ;;  %v747_v36 = vmul.f32 0.03125, %v745_v57 }
 0x683   :  { %v749_v59 = vadd.f32 1e-06, %v747_v36  ;;  %v954_v36 = vrot.slane %v2441_v21, %v953_v54 }
 0x685   :  { %2281 = vrsqrt.f32 %v749_v59 }
 0x68e   :  { %v2280_v58 = vpop.eup %2279 }
 0x68f   :  { %v752_v62 = vmul.f32 %v2280_v58, %v2572_v40 }
 0x691   :  { %v758_v4 = vmul.f32 %v757_v63, %v752_v62 }
 0x692   :  { %v2282_v2 = vpop.eup %2281 }
 0x693   :  { %v753_v3 = vmul.f32 %v2282_v2, %v2577_v48 }
 0x695   :  { %v759_v5 = vmul.f32 %v757_v63, %v753_v3 }
 0x697   :  { %v760_v7 = vpack.c.bf16 %v759_v5, %v758_v4 }
 0x699   :  { %2071 = vmatmul.mubr.msk.bf16.vlgmr.msra.gmra.mxu0 %vm59_vm0, %v760_v7 }
 0x69a   :  { %2090 = vmatprep.mubr.msk.bf16.mxu0 %vm2345_vm1, %v2344_v6 }
 0x759   :  { %v810_v12 = vpop.f32.mrf.mxu0 }
 0x75a   :  { %833 = vrot.lane.b32.xlu0 %v810_v12, %s2346_s10  ;;  %v1885_v16 = vmul.f32 -1.442695, %v810_v12 }
 0x75b   :  { %v2072_v13 = vpop.f32.mrf.mxu0 }
 0x75c   :  { %2283 = vpow2.f32 %v1885_v16 }
 0x75d   :  { %v813_v14 = vpop.f32.mrf.mxu0 }
 0x75e   :  { %835 = vrot.lane.b32.xlu1 %v813_v14, %s2346_s10  ;;  %v1886_v17 = vmul.f32 -1.442695, %v813_v14 }
 0x75f   :  { %v2073_v15 = vpop.f32.mrf.mxu0 }
 0x760   :  { %2285 = vpow2.f32 %v1886_v17 }
 0x769   :  { %v2284_v19 = vpop.eup %2283 }
 0x76a   :  { %v823_v22 = vadd.f32 1.0, %v2284_v19 }
 0x76c   :  { %2287 = vrcp.f32 %v823_v22 }
 0x76d   :  { %v2286_v20 = vpop.eup %2285 }
 0x76e   :  { %v824_v23 = vadd.f32 1.0, %v2286_v20 }
 0x770   :  { %2289 = vrcp.f32 %v824_v23 }
 0x779   :  { %v2288_v24 = vpop.eup %2287 }
 0x77a   :  { %v829_v27 = vmul.f32 %v2288_v24, %v810_v12 }
 0x77d   :  { %v2290_v25 = vpop.eup %2289 }
 0x77e   :  { %v830_v28 = vmul.f32 %v2290_v25, %v813_v14 }
 0x7cc   :  { %v834_v26 = vpop.permute.xlu0 %833 }
 0x7cd   :  { %v839_v31 = vmul.f32 %v834_v26, %v829_v27 }
 0x7d0   :  { %v836_v30 = vpop.permute.xlu1 %835 }
 0x7d1   :  { %v840_v32 = vmul.f32 %v836_v30, %v830_v28 }
 0x7d3   :  { %v841_v35 = vpack.c.bf16 %v840_v32, %v839_v31 }
 0x7d5   :  { %2083 = vmatmul.mubr.msk.bf16.vlgmr.msra.gmra.mxu1 %vm866_vm5, %v841_v35 }
 0x7d6   :  { %2102 = vmatprep.mubr.msk.bf16.mxu1 %vm2345_vm1, %v2344_v6 }
 0x895   :  { %v904_v37 = vpop.f32.mrf.mxu1 }
 0x896   :  { %v2620_v41 = vadd.f32 %v904_v37, %v2572_v40  ;;  %v2231_v40 = vld [vmem:[%s2812_s4 + $0x28] sm:$0xff]  }
 0x897   :  { %v2084_v42 = vpop.f32.mrf.mxu1  ;;  %2087 = vmatpush3.bf16.msra.mxu0 %v2231_v40 }
 0x898   :  { %v935_v43 = vmul.f32 %v2620_v41, %v2620_v41  ;;  %2088 = vmatprep.subr.bf16.mxu0 %v2344_v6 }
 0x899   :  { %v907_v44 = vpop.f32.mrf.mxu1 }
 0x89a   :  { %v2625_v34 = vadd.f32 %v907_v44, %v2577_v48  ;;  %v937_v45 = vsel %vm59_vm0, %v935_v43, 0.0  ;;  %v2232_v48 = vld [vmem:[%s2812_s4 + $0x20] sm:$0xff]  }
 0x89b   :  { %938 = vadd.xlane.f32.xlu1 %v937_v45  ;;  %v2085_v46 = vpop.f32.mrf.mxu1  ;;  %2089 = vmatpush3.bf16.msra.mxu0 %v2232_v48 }
 0x89c   :  { %v936_v47 = vmul.f32 %v2625_v34, %v2625_v34  ;;  %2094 = vmatprep.subr.bf16.mxu0 %v2344_v6 }
 0x89e   :  { %v940_v49 = vsel %vm59_vm0, %v936_v47, 0.0 }
 0x89f   :  { %941 = vadd.xlane.f32.xlu0 %v940_v49 }
 0x924   :  { %v939_v50 = vpop.xlane.xlu1 %938 }
 0x925   :  { %v943_v51 = vmul.f32 0.03125, %v939_v50 }
 0x927   :  { %v945_v52 = vadd.f32 1e-06, %v943_v51 }
 0x928   :  { %v942_v0 = vpop.xlane.xlu0 %941 }
 0x929   :  { %2291 = vrsqrt.f32 %v945_v52  ;;  %v944_v1 = vmul.f32 0.03125, %v942_v0 }
 0x92b   :  { %v946_v53 = vadd.f32 1e-06, %v944_v1 }
 0x92d   :  { %2293 = vrsqrt.f32 %v946_v53 }
 0x936   :  { %v2292_v56 = vpop.eup %2291 }
 0x937   :  { %v949_v57 = vmul.f32 %v2292_v56, %v2620_v41 }
 0x939   :  { %v955_v58 = vmul.f32 %v954_v36, %v949_v57 }
 0x93a   :  { %v2294_v59 = vpop.eup %2293 }
 0x93b   :  { %v950_v61 = vmul.f32 %v2294_v59, %v2625_v34 }
 0x93d   :  { %v956_v62 = vmul.f32 %v954_v36, %v950_v61 }
 0x93f   :  { %v957_v63 = vpack.c.bf16 %v956_v62, %v955_v58 }
 0x941   :  { %2091 = vmatmul.mubr.msk.bf16.vlgmr.msra.gmra.mxu0 %vm59_vm0, %v957_v63 }
 0x942   :  { %2096 = vmatprep.mubr.msk.bf16.mxu0 %vm2345_vm1, %v2344_v6 }
 0xa01   :  { %v1007_v2 = vpop.f32.mrf.mxu0 }
 0xa02   :  { %v1016_v3 = vmul.f32 %v1007_v2, %v2449_v29  ;;  %v1014_v10 = vmul.f32 %v1007_v2, %v2462_v38 }
 0xa03   :  { %v2092_v4 = vpop.f32.mrf.mxu0 }
 0xa04   :  { %1020 = vrot.lane.b32.xlu0 %v1016_v3, %s2346_s10 }
 0xa05   :  { %v1010_v5 = vpop.f32.mrf.mxu0 }
 0xa06   :  { %v1017_v21 = vmul.f32 %v1010_v5, %v2452_v33  ;;  %v2649_v7 = vpack.c.bf16 %v1010_v5, %v1007_v2  ;;  %v1015_v11 = vmul.f32 %v1010_v5, %v2467_v39 }
 0xa07   :  { %v2093_v8 = vpop.f32.mrf.mxu0 }
 0xa08   :  { %1022 = vrot.lane.b32.xlu1 %v1017_v21, %s2346_s10 }
 0xa76   :  { %v1021_v9 = vpop.permute.xlu0 %1020 }
 0xa77   :  { %v1026_v13 = vadd.f32 %v1021_v9, %v1014_v10 }
 0xa7a   :  { %v1023_v12 = vpop.permute.xlu1 %1022 }
 0xa7b   :  { %v1027_v14 = vadd.f32 %v1023_v12, %v1015_v11 }
 0xa7d   :  { %v1028_v29 = vpack.c.bf16 %v1027_v14, %v1026_v13 }
 0xa7f   :  { %1155 = vrot.lane.b32.xlu0 %v1028_v29, %s2348_s20  ;;  %1030 = vrot.lane.b32.xlu1 %v1028_v29, %s2347_s19 }
 0xa83   :  { %1272 = vrot.lane.b32.xlu0 %v1028_v29, %s2350_s2  ;;  %1274 = vrot.lane.b32.xlu1 %v1028_v29, %s2349_s21 }
 0xa87   :  { %1397 = vrot.lane.b32.xlu1 %v1028_v29, %s2351_s22 }
 0xaf1   :  { %v1031_v33 = vpop.permute.xlu1 %1030  ;;  %v1156_v39 = vpop.permute.xlu0 %1155 }
 0xaf2   :  { %v1036_v15 = vsel %vm164_vm2, %v1031_v33, 0 }
 0xaf3   :  { %2095 = vmatpush3.bf16.xpose.msra.mxu0 %v1036_v15 }
 0xaf4   :  { %2106 = vmatprep.subr.bf16.mxu0 %v2344_v6 }
 0xaf5   :  { %v1275_v38 = vpop.permute.xlu1 %1274  ;;  %v1273_v17 = vpop.permute.xlu0 %1272 }
 0xaf6   :  { %v1280_v16 = vsel %vm164_vm2, %v1275_v38, 0 }
 0xaf9   :  { %v1398_v19 = vpop.permute.xlu1 %1397 }
 0xafa   :  { %2097 = vmatmul.mubr.msk.bf16.vlgmr.msra.gmra.mxu0 %vm164_vm2, %v1028_v29 }
 0xafb   :  { %2107 = vmatpush3.bf16.xpose.msra.mxu0 %v1036_v15  ;;  %2108 = vmatprep.mubr.msk.bf16.mxu0 %vm2345_vm1, %v2344_v6 }
 0xafc   :  { %2118 = vmatprep.subr.bf16.mxu0 %v2344_v6 }
 0xb02   :  { %2109 = vmatmul.mubr.msk.bf16.vlgmr.msra.gmra.mxu0 %vm164_vm2, %v1156_v39 }
 0xb03   :  { %2119 = vmatpush3.bf16.xpose.msra.mxu0 %v1280_v16  ;;  %2120 = vmatprep.mubr.msk.bf16.mxu0 %vm2345_vm1, %v2344_v6 }
 0xb04   :  { %2130 = vmatprep.subr.bf16.mxu0 %v2344_v6 }
 0xb0a   :  { %2121 = vmatmul.mubr.msk.bf16.vlgmr.msra.gmra.mxu0 %vm164_vm2, %v1273_v17 }
 0xb0b   :  { %2131 = vmatpush3.bf16.xpose.msra.mxu0 %v1280_v16  ;;  %2132 = vmatprep.mubr.msk.bf16.mxu0 %vm2345_vm1, %v2344_v6 }
 0xb0c   :  { %2142 = vmatprep.subr.bf16.mxu0 %v2344_v6 }
 0xb12   :  { %2133 = vmatmul.mubr.msk.bf16.vlgmr.msra.gmra.mxu0 %vm164_vm2, %v1398_v19 }
 0xb13   :  { %2146 = vmatprep.mubr.msk.bf16.mxu0 %vm2345_vm1, %v2344_v6 }
 0xbba   :  { %v1072_v20 = vpop.f32.mrf.mxu0 }
 0xbbb   :  { %v1079_v22 = vmul.f32 0.35355338, %v1072_v20 }
 0xbbc   :  { %v2098_v23 = vpop.f32.mrf.mxu0 }
 0xbbd   :  { %v1081_v24 = vadd.f32 %v1079_v22, %v2497_v55 }
 0xbbe   :  { %v1075_v25 = vpop.f32.mrf.mxu0 }
 0xbbf   :  { %v1080_v26 = vmul.f32 0.35355338, %v1075_v25  ;;  %v1083_v27 = vsel %vm216_vm3, %v1081_v24, -inf }
 0xbc0   :  { %1084 = vmax.xlane.f32.xlu0 %v1083_v27  ;;  %v2099_v28 = vpop.f32.mrf.mxu0 }
 0xbc1   :  { %v1082_v30 = vadd.f32 %v1080_v26, %v2503_v60 }
 0xbc2   :  { %v1194_v31 = vpop.f32.mrf.mxu0 }
 0xbc3   :  { %v1201_v32 = vmul.f32 0.35355338, %v1194_v31  ;;  %v1086_v35 = vsel %vm216_vm3, %v1082_v30, -inf }
 0xbc4   :  { %1087 = vmax.xlane.f32.xlu1 %v1086_v35  ;;  %v2110_v37 = vpop.f32.mrf.mxu0 }
 0xbc5   :  { %v1203_v42 = vadd.f32 %v1201_v32, %v2497_v55 }
 0xbc6   :  { %v1197_v43 = vpop.f32.mrf.mxu0 }
 0xbc7   :  { %v1202_v44 = vmul.f32 0.35355338, %v1197_v43  ;;  %v1205_v45 = vsel %vm216_vm3, %v1203_v42, -inf }
 0xbc8   :  { %1206 = vmax.xlane.f32.xlu0 %v1205_v45  ;;  %v2111_v46 = vpop.f32.mrf.mxu0 }
 0xbc9   :  { %v1204_v47 = vadd.f32 %v1202_v44, %v2503_v60 }
 0xbca   :  { %v1316_v49 = vpop.f32.mrf.mxu0 }
 0xbcb   :  { %v1323_v40 = vmul.f32 0.35355338, %v1316_v49  ;;  %v1208_v48 = vsel %vm216_vm3, %v1204_v47, -inf }
 0xbcc   :  { %1209 = vmax.xlane.f32.xlu0 %v1208_v48  ;;  %v2122_v50 = vpop.f32.mrf.mxu0 }
 0xbcd   :  { %v1325_v51 = vadd.f32 %v1323_v40, %v2497_v55 }
 0xbce   :  { %v1319_v52 = vpop.f32.mrf.mxu0 }
 0xbcf   :  { %v1324_v0 = vmul.f32 0.35355338, %v1319_v52  ;;  %v1327_v1 = vsel %vm216_vm3, %v1325_v51, -inf }
 0xbd0   :  { %1328 = vmax.xlane.f32.xlu1 %v1327_v1  ;;  %v2123_v53 = vpop.f32.mrf.mxu0 }
 0xbd1   :  { %v1326_v54 = vadd.f32 %v1324_v0, %v2503_v60 }
 0xbd2   :  { %v1436_v56 = vpop.f32.mrf.mxu0 }
 0xbd3   :  { %v1443_v57 = vmul.f32 0.35355338, %v1436_v56  ;;  %v1330_v36 = vsel %vm216_vm3, %v1326_v54, -inf }
 0xbd4   :  { %1331 = vmax.xlane.f32.xlu0 %v1330_v36  ;;  %v2134_v59 = vpop.f32.mrf.mxu0 }
 0xbd5   :  { %v1445_v61 = vadd.f32 %v1443_v57, %v2497_v55 }
 0xbd6   :  { %v1439_v58 = vpop.f32.mrf.mxu0 }
 0xbd7   :  { %v1444_v62 = vmul.f32 0.35355338, %v1439_v58  ;;  %v1447_v63 = vsel %vm216_vm3, %v1445_v61, -inf }
 0xbd8   :  { %1448 = vmax.xlane.f32.xlu1 %v1447_v63  ;;  %v2135_v2 = vpop.f32.mrf.mxu0 }
 0xbd9   :  { %v1446_v3 = vadd.f32 %v1444_v62, %v2503_v60 }
 0xbdb   :  { %v1450_v4 = vsel %vm216_vm3, %v1446_v3, -inf }
 0xbdc   :  { %1451 = vmax.xlane.f32.xlu0 %v1450_v4 }
 0xbe9   :  { %1104 = vrot.lane.b32.xlu1 %v2649_v7, %s2352_s1 }
 0xbf2   :  { %1346 = vrot.lane.b32.xlu0 %v2649_v7, %s2353_s27 }
 0xc49   :  { %v1085_v5 = vpop.xlane.xlu0 %1084 }
 0xc4a   :  { %v1089_v8 = vsub.f32 %v1081_v24, %v1085_v5 }
 0xc4c   :  { %v1091_v13 = vmul.f32 1.442695, %v1089_v8 }
 0xc4d   :  { %v1088_v21 = vpop.xlane.xlu1 %1087 }
 0xc4e   :  { %v1090_v55 = vsub.f32 %v1082_v30, %v1088_v21 }
 0xc50   :  { %v1093_v11 = vmul.f32 1.442695, %v1090_v55 }
 0xc51   :  { %v1207_v9 = vpop.xlane.xlu0 %1206 }
 0xc52   :  { %v1211_v10 = vsub.f32 %v1203_v42, %v1207_v9 }
 0xc54   :  { %v1213_v12 = vmul.f32 1.442695, %v1211_v10  ;;  %v2233_v10 = vld [vmem:[%s2816_s5 + $0x38] sm:$0xff]  }
 0xc55   :  { %v1210_v14 = vpop.xlane.xlu0 %1209  ;;  %2143 = vmatpush3.bf16.msra.mxu0 %v2233_v10 }
 0xc56   :  { %2295 = vpow2.f32 %v1213_v12  ;;  %v1212_v60 = vsub.f32 %v1204_v47, %v1210_v14  ;;  %2144 = vmatprep.subr.bf16.mxu0 %v2344_v6 }
 0xc57   :  { %2297 = vpow2.f32 %v1093_v11 }
 0xc58   :  { %v1215_v29 = vmul.f32 1.442695, %v1212_v60  ;;  %2299 = vpow2.f32 %v1091_v13 }
 0xc59   :  { %v1329_v33 = vpop.xlane.xlu1 %1328 }
 0xc5a   :  { %2301 = vpow2.f32 %v1215_v29  ;;  %v1333_v15 = vsub.f32 %v1325_v51, %v1329_v33 }
 0xc5c   :  { %v1335_v38 = vmul.f32 1.442695, %v1333_v15  ;;  %v2234_v15 = vld [vmem:[%s2816_s5 + $0x30] sm:$0xff]  }
 0xc5d   :  { %v1332_v7 = vpop.xlane.xlu0 %1331  ;;  %2145 = vmatpush3.bf16.msra.mxu0 %v2234_v15  ;;  %v2237_v15 = vld [vmem:[%s2816_s5 + $0x58] sm:$0xff]  }
 0xc5e   :  { %2303 = vpow2.f32 %v1335_v38  ;;  %v1334_v39 = vsub.f32 %v1326_v54, %v1332_v7  ;;  %2158 = vmatprep.subr.bf16.mxu0 %v2344_v6 }
 0xc60   :  { %v1337_v16 = vmul.f32 1.442695, %v1334_v39 }
 0xc61   :  { %v1449_v17 = vpop.xlane.xlu1 %1448 }
 0xc62   :  { %2305 = vpow2.f32 %v1337_v16  ;;  %v1453_v19 = vsub.f32 %v1445_v61, %v1449_v17 }
 0xc63   :  { %v2296_v20 = vpop.eup %2295 }
 0xc64   :  { %v2298_v22 = vpop.eup %2297  ;;  %v1455_v23 = vmul.f32 1.442695, %v1453_v19  ;;  %v1217_v24 = vsel %vm216_vm3, %v2296_v20, 0.0 }
 0xc65   :  { %1218 = vadd.xlane.f32.xlu1 %v1217_v24  ;;  %v1105_v25 = vpop.permute.xlu1 %1104  ;;  %v1452_v26 = vpop.xlane.xlu0 %1451  ;;  %v1098_v52 = vsel %vm216_vm3, %v2298_v22, 0.0 }
 0xc66   :  { %v2300_v27 = vpop.eup %2299  ;;  %2307 = vpow2.f32 %v1455_v23  ;;  %v1454_v28 = vsub.f32 %v1446_v3, %v1452_v26  ;;  %2101 = vmatpush3.bf16.msra.mxu1 %v1105_v25 }
 0xc67   :  { %v2302_v30 = vpop.eup %2301  ;;  %v1101_v31 = vpack.c.bf16 %v2298_v22, %v2300_v27  ;;  %2112 = vmatprep.subr.bf16.mxu1 %v2344_v6  ;;  %v1095_v48 = vsel %vm216_vm3, %v2300_v27, 0.0 }
 0xc68   :  { %v1457_v32 = vmul.f32 1.442695, %v1454_v28  ;;  %v1220_v35 = vsel %vm216_vm3, %v2302_v30, 0.0  ;;  %v1223_v44 = vpack.c.bf16 %v2302_v30, %v2296_v20 }
 0xc69   :  { %2103 = vmatmul.mubr.msk.bf16.vlgmr.msra.gmra.mxu1 %vm216_vm3, %v1101_v31  ;;  %1221 = vadd.xlane.f32.xlu0 %v1220_v35  ;;  %v1347_v46 = vpop.permute.xlu0 %1346 }
 0xc6a   :  { %2309 = vpow2.f32 %v1457_v32  ;;  %2113 = vmatpush3.bf16.msra.mxu1 %v1105_v25  ;;  %2114 = vmatprep.mubr.msk.bf16.mxu1 %vm2345_vm1, %v2344_v6 }
 0xc6b   :  { %v2304_v37 = vpop.eup %2303  ;;  %2124 = vmatprep.subr.bf16.mxu1 %v2344_v6 }
 0xc6c   :  { %v1339_v42 = vsel %vm216_vm3, %v2304_v37, 0.0 }
 0xc6d   :  { %1340 = vadd.xlane.f32.xlu1 %v1339_v42 }
 0xc6f   :  { %v2306_v43 = vpop.eup %2305 }
 0xc70   :  { %v1342_v45 = vsel %vm216_vm3, %v2306_v43, 0.0  ;;  %v1345_v51 = vpack.c.bf16 %v2306_v43, %v2304_v37 }
 0xc71   :  { %2115 = vmatmul.mubr.msk.bf16.vlgmr.msra.gmra.mxu1 %vm216_vm3, %v1223_v44  ;;  %1343 = vadd.xlane.f32.xlu0 %v1342_v45 }
 0xc72   :  { %2125 = vmatpush3.bf16.msra.mxu1 %v1347_v46  ;;  %2126 = vmatprep.mubr.msk.bf16.mxu1 %vm2345_vm1, %v2344_v6 }
 0xc73   :  { %v2308_v47 = vpop.eup %2307  ;;  %2136 = vmatprep.subr.bf16.mxu1 %v2344_v6 }
 0xc74   :  { %v1459_v49 = vsel %vm216_vm3, %v2308_v47, 0.0 }
 0xc75   :  { %1460 = vadd.xlane.f32.xlu1 %v1459_v49 }
 0xc77   :  { %v2310_v40 = vpop.eup %2309 }
 0xc78   :  { %v1462_v50 = vsel %vm216_vm3, %v2310_v40, 0.0  ;;  %v1465_v0 = vpack.c.bf16 %v2310_v40, %v2308_v47 }
 0xc79   :  { %1096 = vadd.xlane.f32.xlu1 %v1095_v48  ;;  %1463 = vadd.xlane.f32.xlu0 %v1462_v50 }
 0xc7a   :  { %2127 = vmatmul.mubr.msk.bf16.vlgmr.msra.gmra.mxu1 %vm216_vm3, %v1345_v51 }
 0xc7b   :  { %2137 = vmatpush3.bf16.msra.mxu1 %v1347_v46  ;;  %2138 = vmatprep.mubr.msk.bf16.mxu1 %vm2345_vm1, %v2344_v6 }
 0xc7c   :  { %2150 = vmatprep.subr.bf16.mxu1 %v2344_v6 }
 0xc7d   :  { %1099 = vadd.xlane.f32.xlu0 %v1098_v52 }
 0xc82   :  { %2139 = vmatmul.mubr.msk.bf16.vlgmr.msra.gmra.mxu1 %vm216_vm3, %v1465_v0 }
 0xc83   :  { %2154 = vmatprep.mubr.msk.bf16.mxu1 %vm2345_vm1, %v2344_v6 }
 0xcee   :  { %v1219_v1 = vpop.xlane.xlu1 %1218 }
 0xcef   :  { %2311 = vrcp.f32 %v1219_v1 }
 0xcf2   :  { %v1222_v53 = vpop.xlane.xlu0 %1221 }
 0xcf3   :  { %2313 = vrcp.f32 %v1222_v53 }
 0xcf6   :  { %v1341_v57 = vpop.xlane.xlu1 %1340 }
 0xcf7   :  { %2315 = vrcp.f32 %v1341_v57 }
 0xcfa   :  { %v1344_v59 = vpop.xlane.xlu0 %1343 }
 0xcfb   :  { %2317 = vrcp.f32 %v1344_v59 }
 0xcfc   :  { %v2312_v63 = vpop.eup %2311 }
 0xcfe   :  { %v1461_v3 = vpop.xlane.xlu1 %1460 }
 0xcff   :  { %2319 = vrcp.f32 %v1461_v3 }
 0xd00   :  { %v2314_v2 = vpop.eup %2313 }
 0xd02   :  { %v1464_v5 = vpop.xlane.xlu0 %1463  ;;  %v1097_v26 = vpop.xlane.xlu1 %1096 }
 0xd03   :  { %2321 = vrcp.f32 %v1464_v5 }
 0xd04   :  { %v2316_v13 = vpop.eup %2315  ;;  %2323 = vrcp.f32 %v1097_v26 }
 0xd06   :  { %v1100_v27 = vpop.xlane.xlu0 %1099 }
 0xd07   :  { %2325 = vrcp.f32 %v1100_v27 }
 0xd08   :  { %v2318_v14 = vpop.eup %2317 }
 0xd0c   :  { %v2320_v17 = vpop.eup %2319 }
 0xd10   :  { %v2322_v19 = vpop.eup %2321 }
 0xd11   :  { %v2324_v31 = vpop.eup %2323 }
 0xd14   :  { %v2326_v37 = vpop.eup %2325 }
 0xd29   :  { %v1144_v54 = vpop.f32.mrf.mxu1 }
 0xd2a   :  { %v1152_v44 = vmul.f32 %v2324_v31, %v1144_v54 }
 0xd2b   :  { %v2104_v56 = vpop.f32.mrf.mxu1 }
 0xd2d   :  { %v1147_v36 = vpop.f32.mrf.mxu1 }
 0xd2e   :  { %v1154_v45 = vmul.f32 %v2326_v37, %v1147_v36 }
 0xd2f   :  { %v2105_v61 = vpop.f32.mrf.mxu1 }
 0xd31   :  { %v1261_v58 = vpop.f32.mrf.mxu1 }
 0xd32   :  { %v1269_v21 = vmul.f32 %v2312_v63, %v1261_v58 }
 0xd33   :  { %v2116_v62 = vpop.f32.mrf.mxu1 }
 0xd35   :  { %v1264_v4 = vpop.f32.mrf.mxu1 }
 0xd36   :  { %v1271_v55 = vmul.f32 %v2314_v2, %v1264_v4 }
 0xd37   :  { %v2117_v8 = vpop.f32.mrf.mxu1 }
 0xd38   :  { %v2206_v9 = vpack.i.bf16 %v1271_v55, %v1269_v21  ;;  %v1621_v8 = vsub.s32 3, %v2435_v18 }
 0xd3a   :  { %v1386_v11 = vpop.f32.mrf.mxu1  ;;  %2207 = vrot.lane.b32.xlu1 %v2206_v9, %s2354_s0 }
 0xd3b   :  { %v1394_v29 = vmul.f32 %v2316_v13, %v1386_v11  ;;  %v2766_v11 = vld [vmem:[%s2814_s3] sm:$0x1f] }
 0xd3c   :  { %v2128_v12 = vpop.f32.mrf.mxu1 }
 0xd3d   :  { %v1622_v12 = vrot.slane %v2766_v11, %v1621_v8 }
 0xd3e   :  { %v1389_v60 = vpop.f32.mrf.mxu1 }
 0xd3f   :  { %v1396_v33 = vmul.f32 %v2318_v14, %v1389_v60 }
 0xd40   :  { %v2129_v38 = vpop.f32.mrf.mxu1 }
 0xd41   :  { %v2211_v7 = vpack.i.bf16 %v1396_v33, %v1394_v29  ;;  %v2238_v38 = vld [vmem:[%s2816_s5 + $0x50] sm:$0xff]  }
 0xd42   :  { %v1503_v39 = vpop.f32.mrf.mxu1 }
 0xd43   :  { %2212 = vrot.lane.b32.xlu0 %v2211_v7, %s2355_s9  ;;  %v1511_v22 = vmul.f32 %v2320_v17, %v1503_v39  ;;  %v2239_v7 = vld [vmem:[%s2816_s5 + $0x48] sm:$0xff]   ;;  %v2240_v39 = vld [vmem:[%s2816_s5 + $0x40] sm:$0xff]  }
 0xd44   :  { %v2140_v16 = vpop.f32.mrf.mxu1 }
 0xd46   :  { %v1506_v20 = vpop.f32.mrf.mxu1 }
 0xd47   :  { %v1513_v23 = vmul.f32 %v2322_v19, %v1506_v20 }
 0xd48   :  { %v2141_v24 = vpop.f32.mrf.mxu1 }
 0xd49   :  { %v2216_v25 = vpack.i.bf16 %v1513_v23, %v1511_v22 }
 0xd4b   :  { %2217 = vrot.lane.b32.xlu1 %v2216_v25, %s2356_s11 }
 0xdac   :  { %v2208_v28 = vpop.permute.xlu1 %2207 }
 0xdad   :  { %v2210_v32 = vunpack.i.h.bf16 %v2208_v28  ;;  %v2209_v35 = vunpack.i.l.bf16 %v2208_v28 }
 0xdaf   :  { %v1538_v47 = vsel %vm164_vm2, %v1152_v44, %v2209_v35  ;;  %v1539_v49 = vsel %vm164_vm2, %v1154_v45, %v2210_v32 }
 0xdb5   :  { %v2213_v30 = vpop.permute.xlu0 %2212 }
 0xdb6   :  { %v2215_v42 = vunpack.i.h.bf16 %v2213_v30  ;;  %v2214_v43 = vunpack.i.l.bf16 %v2213_v30 }
 0xdb8   :  { %v1541_v50 = vsel %vm216_vm3, %v1539_v49, %v2215_v42  ;;  %v1540_v51 = vsel %vm216_vm3, %v1538_v47, %v2214_v43 }
 0xdbd   :  { %v2218_v46 = vpop.permute.xlu1 %2217 }
 0xdbe   :  { %v2220_v40 = vunpack.i.h.bf16 %v2218_v46  ;;  %v2219_v48 = vunpack.i.l.bf16 %v2218_v46 }
 0xdc0   :  { %v1542_v52 = vsel %vm676_vm4, %v1540_v51, %v2219_v48  ;;  %v1543_v0 = vsel %vm676_vm4, %v1541_v50, %v2220_v40 }
 0xdc1   :  { %v1544_v1 = vpack.c.bf16 %v1543_v0, %v1542_v52 }
 0xdc3   :  { %2147 = vmatmul.mubr.msk.bf16.vlgmr.msra.gmra.mxu0 %vm59_vm0, %v1544_v1  ;;  %v2241_v1 = vld [vmem:[%s2817_s6 + $0x8] sm:$0xff]  }
 0xdc4   :  { %2166 = vmatprep.mubr.msk.bf16.mxu0 %vm2345_vm1, %v2344_v6  ;;  %2159 = vmatpush3.bf16.msra.mxu0 %v2237_v15 }
 0xdc5   :  { %2160 = vmatprep.subr.bf16.mxu0 %v2344_v6 }
 0xdc8   :  { %2161 = vmatpush3.bf16.msra.mxu0 %v2238_v38 }
 0xdc9   :  { %2162 = vmatprep.subr.bf16.mxu0 %v2344_v6 }
 0xdcc   :  { %2163 = vmatpush3.bf16.msra.mxu0 %v2239_v7 }
 0xdcd   :  { %2164 = vmatprep.subr.bf16.mxu0 %v2344_v6 }
 0xdd0   :  { %2165 = vmatpush3.bf16.msra.mxu0 %v2240_v39 }
 0xe83   :  { %v1594_v53 = vpop.f32.mrf.mxu0 }
 0xe84   :  { %v2742_v54 = vadd.f32 %v1594_v53, %v2620_v41  ;;  %v2235_v41 = vld [vmem:[%s2812_s4 + $0x38] sm:$0xff]   ;;  %v2242_v53 = vld [vmem:[%s2817_s6] sm:$0xff]  }
 0xe85   :  { %v2148_v56 = vpop.f32.mrf.mxu0  ;;  %2151 = vmatpush3.bf16.msra.mxu1 %v2235_v41 }
 0xe86   :  { %v1603_v57 = vmul.f32 %v2742_v54, %v2742_v54  ;;  %2152 = vmatprep.subr.bf16.mxu1 %v2344_v6 }
 0xe87   :  { %v1597_v36 = vpop.f32.mrf.mxu0 }
 0xe88   :  { %v2747_v59 = vadd.f32 %v1597_v36, %v2625_v34  ;;  %v1605_v61 = vsel %vm59_vm0, %v1603_v57, 0.0  ;;  %v2236_v34 = vld [vmem:[%s2812_s4 + $0x30] sm:$0xff]  }
 0xe89   :  { %1606 = vadd.xlane.f32.xlu1 %v1605_v61  ;;  %v2149_v58 = vpop.f32.mrf.mxu0  ;;  %2153 = vmatpush3.bf16.msra.mxu1 %v2236_v34 }
 0xe8a   :  { %v1604_v62 = vmul.f32 %v2747_v59, %v2747_v59  ;;  %2170 = vmatprep.subr.bf16.mxu1 %v2344_v6  ;;  %v1795_v58 = vsub.s32 4, %v2435_v18 }
 0xe8c   :  { %v1608_v63 = vsel %vm59_vm0, %v1604_v62, 0.0  ;;  %v1796_v41 = vrot.slane %v2766_v11, %v1795_v58 }
 0xe8d   :  { %1609 = vadd.xlane.f32.xlu0 %v1608_v63 }
 0xf12   :  { %v1607_v2 = vpop.xlane.xlu1 %1606 }
 0xf13   :  { %v1611_v3 = vmul.f32 0.03125, %v1607_v2 }
 0xf15   :  { %v1613_v4 = vadd.f32 1e-06, %v1611_v3 }
 0xf16   :  { %v1610_v5 = vpop.xlane.xlu0 %1609 }
 0xf17   :  { %2327 = vrsqrt.f32 %v1613_v4  ;;  %v1612_v21 = vmul.f32 0.03125, %v1610_v5 }
 0xf19   :  { %v1614_v55 = vadd.f32 1e-06, %v1612_v21 }
 0xf1b   :  { %2329 = vrsqrt.f32 %v1614_v55 }
 0xf24   :  { %v2328_v9 = vpop.eup %2327 }
 0xf25   :  { %v1617_v10 = vmul.f32 %v2328_v9, %v2742_v54 }
 0xf27   :  { %v1623_v60 = vmul.f32 %v1622_v12, %v1617_v10 }
 0xf28   :  { %v2330_v13 = vpop.eup %2329 }
 0xf29   :  { %v1618_v14 = vmul.f32 %v2330_v13, %v2747_v59 }
 0xf2b   :  { %v1624_v29 = vmul.f32 %v1622_v12, %v1618_v14 }
 0xf2d   :  { %v1625_v33 = vpack.c.bf16 %v1624_v29, %v1623_v60 }
 0xf2f   :  { %2155 = vmatmul.mubr.msk.bf16.vlgmr.msra.gmra.mxu1 %vm59_vm0, %v1625_v33 }
 0xf30   :  { %2174 = vmatprep.mubr.msk.bf16.mxu1 %vm2345_vm1, %v2344_v6  ;;  %2171 = vmatpush3.bf16.msra.mxu1 %v2241_v1 }
 0xf31   :  { %2172 = vmatprep.subr.bf16.mxu1 %v2344_v6 }
 0xf34   :  { %2173 = vmatpush3.bf16.msra.mxu1 %v2242_v53 }
 0xfef   :  { %v1675_v16 = vpop.f32.mrf.mxu1 }
 0xff0   :  { %1698 = vrot.lane.b32.xlu0 %v1675_v16, %s2346_s10  ;;  %v1929_v22 = vmul.f32 -1.442695, %v1675_v16 }
 0xff1   :  { %v2156_v17 = vpop.f32.mrf.mxu1 }
 0xff2   :  { %2331 = vpow2.f32 %v1929_v22 }
 0xff3   :  { %v1678_v19 = vpop.f32.mrf.mxu1 }
 0xff4   :  { %1700 = vrot.lane.b32.xlu1 %v1678_v19, %s2346_s10  ;;  %v1930_v23 = vmul.f32 -1.442695, %v1678_v19 }
 0xff5   :  { %v2157_v20 = vpop.f32.mrf.mxu1 }
 0xff6   :  { %2333 = vpow2.f32 %v1930_v23 }
 0xfff   :  { %v2332_v24 = vpop.eup %2331 }
0x1000   :  { %v1688_v26 = vadd.f32 1.0, %v2332_v24 }
0x1002   :  { %2335 = vrcp.f32 %v1688_v26 }
0x1003   :  { %v2334_v25 = vpop.eup %2333 }
0x1004   :  { %v1689_v27 = vadd.f32 1.0, %v2334_v25 }
0x1006   :  { %2337 = vrcp.f32 %v1689_v27 }
0x100f   :  { %v2336_v28 = vpop.eup %2335 }
0x1010   :  { %v1694_v32 = vmul.f32 %v2336_v28, %v1675_v16 }
0x1013   :  { %v2338_v30 = vpop.eup %2337 }
0x1014   :  { %v1695_v35 = vmul.f32 %v2338_v30, %v1678_v19 }
0x1062   :  { %v1699_v31 = vpop.permute.xlu0 %1698 }
0x1063   :  { %v1704_v42 = vmul.f32 %v1699_v31, %v1694_v32 }
0x1066   :  { %v1701_v37 = vpop.permute.xlu1 %1700 }
0x1067   :  { %v1705_v43 = vmul.f32 %v1701_v37, %v1695_v35 }
0x1069   :  { %v1706_v44 = vpack.c.bf16 %v1705_v43, %v1704_v42 }
0x106b   :  { %2167 = vmatmul.mubr.msk.bf16.vlgmr.msra.gmra.mxu0 %vm866_vm5, %v1706_v44 }
0x112b   :  { %v1768_v45 = vpop.f32.mrf.mxu0 }
0x112c   :  { %v1775_v46 = vadd.f32 %v1768_v45, %v2742_v54 }
0x112d   :  { %v2168_v47 = vpop.f32.mrf.mxu0 }
0x112e   :  { %v1777_v49 = vmul.f32 %v1775_v46, %v1775_v46 }
0x112f   :  { %v1771_v40 = vpop.f32.mrf.mxu0 }
0x1130   :  { %v1776_v48 = vadd.f32 %v1771_v40, %v2747_v59  ;;  %v1779_v50 = vsel %vm59_vm0, %v1777_v49, 0.0 }
0x1131   :  { %1780 = vadd.xlane.f32.xlu1 %v1779_v50  ;;  %v2169_v51 = vpop.f32.mrf.mxu0 }
0x1132   :  { %v1778_v52 = vmul.f32 %v1776_v48, %v1776_v48 }
0x1134   :  { %v1782_v0 = vsel %vm59_vm0, %v1778_v52, 0.0 }
0x1135   :  { %1783 = vadd.xlane.f32.xlu0 %v1782_v0 }
0x11ba   :  { %v1781_v54 = vpop.xlane.xlu1 %1780 }
0x11bb   :  { %v1785_v56 = vmul.f32 0.03125, %v1781_v54 }
0x11bd   :  { %v1787_v57 = vadd.f32 1e-06, %v1785_v56 }
0x11be   :  { %v1784_v36 = vpop.xlane.xlu0 %1783 }
0x11bf   :  { %2339 = vrsqrt.f32 %v1787_v57  ;;  %v1786_v59 = vmul.f32 0.03125, %v1784_v36 }
0x11c1   :  { %v1788_v61 = vadd.f32 1e-06, %v1786_v59 }
0x11c3   :  { %2341 = vrsqrt.f32 %v1788_v61 }
0x11cc   :  { %v2340_v62 = vpop.eup %2339 }
0x11cd   :  { %v1791_v63 = vmul.f32 %v2340_v62, %v1775_v46 }
0x11cf   :  { %v1797_v3 = vmul.f32 %v1796_v41, %v1791_v63 }
0x11d0   :  { %v2342_v34 = vpop.eup %2341 }
0x11d1   :  { %v1792_v2 = vmul.f32 %v2342_v34, %v1776_v48 }
0x11d3   :  { %v1798_v4 = vmul.f32 %v1796_v41, %v1792_v2 }
0x11d5   :  { %v1803_v6 = vpack.c.bf16 %v1798_v4, %v1797_v3 }
0x11d7   :  { %2175 = vmatmul.mubr.msk.bf16.vlgmr.msra.gmra.mxu1 %vm59_vm0, %v1803_v6 }
0x1297   :  { %v1853_v5 = vpop.f32.mrf.mxu1 }
0x1298   :  { %1860 = vst [vmem:[%s2818_s7] sm:$0xff] %v1853_v5 }
0x1299   :  { %v2176_v21 = vpop.f32.mrf.mxu1 }
0x129b   :  { %v1856_v55 = vpop.f32.mrf.mxu1 }
0x129c   :  { %1861 = vst [vmem:[%s2818_s7 + $0x8] sm:$0xff] %v1856_v55 }
0x129d   :  { %v2177_v18 = vpop.f32.mrf.mxu1 }

</bundles_post_ra>
